<compile_context>
chip_gen: v7x
topology: tpu7x:2x2x1
jax: 0.10.0
libtpu: 0.0.40
codegen_flags: <defaults>
</compile_context>

<pallas_src>
import functools

import numpy as np
import jax
import jax.numpy as jnp
from jax.experimental import pallas as pl
from jax.experimental.pallas import tpu as pltpu

EPS = 1e-5
SOFTPLUS_THRESHOLD = 20.0


def _tpu_budgets():
    """Generation-aware VMEM budget + max M tile (review item 6)."""
    try:
        phys = pltpu.get_tpu_info().vmem_capacity_bytes
    except Exception:
        phys = 64 * 1024 * 1024                      # assume the smallest (v7x)
    if phys >= 128 * 1024 * 1024:                    # v5e / v6e: 128 MiB physical
        return 96 * 1024 * 1024, 1024
    return 32 * 1024 * 1024, 512                     # v7x: 64 MiB physical


VMEM_LIMIT, TM_MAX = _tpu_budgets()


# ----------------------------------------------------------------------------
# Pallas kernels
# ----------------------------------------------------------------------------
def _conv_bn_relu_kernel(p_ref, w_ref, g_ref, b_ref, o_ref, y_ref, sum_ref,
                         *, tm, m_valid, inv_m):
    """Fused conv-as-matmul + train-mode BatchNorm2d + ReLU.

    p_ref  : (TM, KC)      bf16 im2col patch tile (grid axis over M)
    w_ref  : (KC, Cout)    bf16 flattened conv weight (resident)
    g_ref, b_ref : (1, Cout) f32 BN affine params (resident)
    o_ref  : (m_pad, Cout) bf16 output, resident across the grid, written once
    y_ref  : (m_pad, Cout) f32 VMEM scratch holding the pre-BN conv output
    sum_ref: (1, Cout)     f32 running per-channel sum
    """
    i = pl.program_id(0)
    nt = pl.num_programs(0)

    @pl.when(i == 0)
    def _init():
        sum_ref[...] = jnp.zeros_like(sum_ref)

    y = jnp.dot(p_ref[...], w_ref[...], preferred_element_type=jnp.float32)
    row0 = pl.multiple_of(i * tm, tm)
    y_ref[pl.ds(row0, tm), :] = y
    sum_ref[...] += jnp.sum(y, axis=0, keepdims=True)

    @pl.when(i == nt - 1)
    def _finalize():
        mean = sum_ref[...] * inv_m                       # (1, Cout)
        yf = y_ref[...]                                   # (m_pad, Cout) f32
        rows = jax.lax.broadcasted_iota(jnp.int32, yf.shape, 0)
        centered = jnp.where(rows < m_valid, yf - mean, 0.0)
        var = jnp.sum(centered * centered, axis=0, keepdims=True) * inv_m
        scale = g_ref[...] * jax.lax.rsqrt(var + EPS)
        shift = b_ref[...] - mean * scale
        o_ref[...] = jnp.maximum(yf * scale + shift, 0.0).astype(o_ref.dtype)


def _head_kernel(x_ref, wo_ref, g_ref, b_ref, wc_ref, mu_ref, sig_ref,
                 *, apply_bn, latent):
    """Output 1x1 block + _SqueezeLayer BN1d + ReLU + compressor + mu/sigma.

    x_ref : (N, Cin) bf16       wo_ref : (Cin, 4w) bf16
    g_ref, b_ref : (1, 4w) f32  wc_ref : (4w, 2w) bf16 (mu|sigma columns)
    mu_ref, sig_ref : (N, w) f32
    """
    h = jnp.dot(x_ref[...], wo_ref[...], preferred_element_type=jnp.float32)
    if apply_bn:  # static: torch applies BatchNorm1d only when batch > 1
        mean = jnp.mean(h, axis=0, keepdims=True)
        var = jnp.mean((h - mean) ** 2, axis=0, keepdims=True)
        h = (h - mean) * jax.lax.rsqrt(var + EPS) * g_ref[...] + b_ref[...]
    h = jnp.maximum(h, 0.0).astype(wc_ref.dtype)          # bf16 for the MXU
    r = jnp.dot(h, wc_ref[...], preferred_element_type=jnp.float32)  # (N, 2w)
    mu_ref[...] = r[:, :latent]
    s = r[:, latent:]
    # exp(softplus(s)) with threshold 20  ==  where(s > 20, exp(s), 1 + exp(s))
    sig_ref[...] = jnp.where(s > SOFTPLUS_THRESHOLD, jnp.exp(s), 1.0 + jnp.exp(s))


# ----------------------------------------------------------------------------
# Pallas wrappers
# ----------------------------------------------------------------------------
def _round_up(x, m):
    return (x + m - 1) // m * m


def _m_tiling(M):
    """One tile when the (8-rounded) M fits TM_MAX, otherwise TM_MAX tiles."""
    m8 = _round_up(M, 8)
    if m8 <= TM_MAX:
        return m8, m8
    return TM_MAX, _round_up(M, TM_MAX)


def _fused_vmem_bytes(m_pad, tm, KC, Cout):
    """Rough VMEM footprint of the fused conv kernel (lane/sublane padded)."""
    lanes = _round_up(Cout, 128)
    kc_lanes = _round_up(KC, 128)
    return (m_pad * lanes * 4                 # f32 pre-BN scratch
            + m_pad * lanes * 2               # resident bf16 output block
            + _round_up(KC, 8) * lanes * 2    # resident weight
            + 2 * tm * kc_lanes * 2           # double-buffered patch tiles
            + 8 * lanes * 4)                  # channel-sum scratch


def conv_bn_relu(patches, w2d, gamma, beta):
    """One fused pallas_call: conv (im2col matmul) + BN(batch stats) + ReLU."""
    M, KC = patches.shape
    Cout = w2d.shape[1]
    tm, m_pad = _m_tiling(M)
    # TODO(synk): two-pass / Cout-split fallback for layers whose pre-BN tensor
    # does not fit VMEM (not reachable at the shapes used in this script).
    assert _fused_vmem_bytes(m_pad, tm, KC, Cout) <= VMEM_LIMIT
    if m_pad != M:
        # zero rows contribute nothing to the channel sums; variance masks them
        patches = jnp.pad(patches, ((0, m_pad - M), (0, 0)))
    nt = m_pad // tm
    g = gamma.reshape(1, Cout).astype(jnp.float32)
    b = beta.reshape(1, Cout).astype(jnp.float32)

    cost = pl.CostEstimate(
        flops=2 * m_pad * KC * Cout + 6 * m_pad * Cout,
        transcendentals=Cout,
        bytes_accessed=m_pad * KC * 2 + KC * Cout * 2 + m_pad * Cout * 2)

    out = pl.pallas_call(
        functools.partial(_conv_bn_relu_kernel,
                          tm=tm, m_valid=M, inv_m=1.0 / float(M)),
        out_shape=jax.ShapeDtypeStruct((m_pad, Cout), jnp.bfloat16),
        grid=(nt,),
        in_specs=[pl.BlockSpec((tm, KC), lambda i: (i, 0)),
                  pl.BlockSpec((KC, Cout), lambda i: (0, 0)),
                  pl.BlockSpec((1, Cout), lambda i: (0, 0)),
                  pl.BlockSpec((1, Cout), lambda i: (0, 0))],
        out_specs=pl.BlockSpec((m_pad, Cout), lambda i: (0, 0)),  # resident
        scratch_shapes=[pltpu.VMEM((m_pad, Cout), jnp.float32),
                        pltpu.VMEM((1, Cout), jnp.float32)],
        compiler_params=pltpu.CompilerParams(
            dimension_semantics=("arbitrary",),   # stats + resident output
            vmem_limit_bytes=VMEM_LIMIT),
        cost_estimate=cost,
    )(patches, w2d, g, b)
    return out[:M] if m_pad != M else out


def head(x_vec, w_out2d, gamma, beta, w_comp):
    N, Cin = x_vec.shape
    F4 = w_out2d.shape[1]
    two_lat = w_comp.shape[1]
    latent = two_lat // 2
    g = gamma.reshape(1, F4).astype(jnp.float32)
    b = beta.reshape(1, F4).astype(jnp.float32)

    def full(shape):
        return pl.BlockSpec(shape, lambda i: tuple(0 for _ in shape))

    cost = pl.CostEstimate(
        flops=2 * N * F4 * (Cin + two_lat) + 8 * N * F4,
        transcendentals=N * latent + F4,
        bytes_accessed=(N * Cin + Cin * F4 + F4 * two_lat) * 2 + 2 * N * latent * 4)
    return pl.pallas_call(
        functools.partial(_head_kernel, apply_bn=(N > 1), latent=latent),
        out_shape=(jax.ShapeDtypeStruct((N, latent), jnp.float32),
                   jax.ShapeDtypeStruct((N, latent), jnp.float32)),
        grid=(1,),
        in_specs=[full((N, Cin)), full((Cin, F4)), full((1, F4)), full((1, F4)),
                  full((F4, two_lat))],
        out_specs=(full((N, latent)), full((N, latent))),
        compiler_params=pltpu.CompilerParams(
            dimension_semantics=("arbitrary",), vmem_limit_bytes=VMEM_LIMIT),
        cost_estimate=cost,
    )(x_vec, w_out2d, g, b, w_comp)


# ----------------------------------------------------------------------------
# Glue: replication padding + im2col on NHWC (layout plumbing, plain JAX)
# ----------------------------------------------------------------------------
def im2col_nhwc(x, K, stride, pad):
    """ReplicationPad2d(pad) + strided patch extraction on an NHWC tensor.

    Returns patches (N*Ho*Wo, K*K*C) with lane order (kh, kw, c)."""
    # TODO(synk): move the replication pad + patch gather into the conv kernel
    # (stride-2 sublane gathers / parity-view slices) so the K*K/stride^2
    # inflated patch matrix never hits HBM (review item 1).
    if pad > 0:
        x = jnp.pad(x, ((0, 0), (pad, pad), (pad, pad), (0, 0)), mode='edge')
    N, Hp, Wp, C = x.shape
    Ho = (Hp - K) // stride + 1
    Wo = (Wp - K) // stride + 1
    cols = []
    for kh in range(K):
        for kw in range(K):
            cols.append(x[:, kh:kh + stride * Ho:stride, kw:kw + stride * Wo:stride, :])
    patches = jnp.stack(cols, axis=3).reshape(N * Ho * Wo, K * K * C)
    return patches, N, Ho, Wo


def _flatten_conv_weight(w):
    """torch Conv2d weight (Cout, Cin, K, K) -> (K*K*Cin, Cout), matching the
    (kh, kw, cin) im2col column order."""
    Cout, Cin, K, _ = w.shape
    return w.transpose(2, 3, 1, 0).reshape(K * K * Cin, Cout)


# ----------------------------------------------------------------------------
# Full Encoder forward (all hot-path compute in Pallas kernels)
# ----------------------------------------------------------------------------
def encoder_forward(x_nchw, params):
    # Single layout conversion; everything downstream stays NHWC (channels on lanes).
    h = jnp.transpose(x_nchw, (0, 2, 3, 1)).astype(jnp.bfloat16)
    for (w, g, b) in params['blocks']:
        Cout, Cin, K, _ = w.shape
        patches, N, Ho, Wo = im2col_nhwc(h, K, stride=2, pad=K // 2)
        w2d = _flatten_conv_weight(w).astype(jnp.bfloat16)
        y = conv_bn_relu(patches, w2d, g, b)          # (N*Ho*Wo, Cout) bf16
        h = y.reshape(N, Ho, Wo, Cout)                # back to NHWC, no transpose
    # output block: 1x1 conv, stride 2, no pad, on 2x2 spatial -> picks pixel (0,0)
    w_out, g_out, b_out = params['out']
    Cout_o, Cin_o, _, _ = w_out.shape
    x_vec = h[:, 0, 0, :]                             # (N, Cin_o), squeezed activations
    w_out2d = w_out.reshape(Cout_o, Cin_o).T.astype(jnp.bfloat16)
    mu, sigma = head(x_vec, w_out2d, g_out, b_out,
                     params['w_comp'].astype(jnp.bfloat16))
    return mu, sigma


# ----------------------------------------------------------------------------
# Pure-JAX reference (same math / same bf16-input quantization) for a sanity check
# ----------------------------------------------------------------------------
def reference_forward(x_nchw, params):
    h = jnp.transpose(x_nchw, (0, 2, 3, 1)).astype(jnp.bfloat16)
    for (w, g, b) in params['blocks']:
        Cout, Cin, K, _ = w.shape
        p, N, Ho, Wo = im2col_nhwc(h, K, 2, K // 2)
        y = jnp.dot(p, _flatten_conv_weight(w).astype(jnp.bfloat16),
                    preferred_element_type=jnp.float32)
        mean = y.mean(0, keepdims=True)
        var = ((y - mean) ** 2).mean(0, keepdims=True)
        a = jnp.maximum((y - mean) * jax.lax.rsqrt(var + EPS) * g[None, :] + b[None, :], 0.0)
        h = a.astype(jnp.bfloat16).reshape(N, Ho, Wo, Cout)
    w_out, g_out, b_out = params['out']
    Cout_o, Cin_o, _, _ = w_out.shape
    xv = h[:, 0, 0, :]
    hh = jnp.dot(xv, w_out.reshape(Cout_o, Cin_o).T.astype(jnp.bfloat16),
                 preferred_element_type=jnp.float32)
    if xv.shape[0] > 1:
        mean = hh.mean(0, keepdims=True)
        var = ((hh - mean) ** 2).mean(0, keepdims=True)
        hh = (hh - mean) * jax.lax.rsqrt(var + EPS) * g_out[None, :] + b_out[None, :]
    hh = jnp.maximum(hh, 0.0).astype(jnp.bfloat16)
    r = jnp.dot(hh, params['w_comp'].astype(jnp.bfloat16), preferred_element_type=jnp.float32)
    latent = params['w_comp'].shape[1] // 2
    mu = r[:, :latent]
    s = r[:, latent:]
    sigma = jnp.where(s > SOFTPLUS_THRESHOLD, jnp.exp(s), 1.0 + jnp.exp(s))
    return mu, sigma


# ----------------------------------------------------------------------------
# Deterministic parameter construction (shapes from Encoder.__init__)
# ----------------------------------------------------------------------------
def make_params(width, key):
    log2 = int(np.log2(width))
    assert 2 ** log2 == width
    nlayers = log2
    plan = [(3, 8, 3)]
    for i in range(nlayers - 2):
        plan.append((2 ** (i + 3), 2 ** (i + 4), 3))
    keys = jax.random.split(key, len(plan) * 3 + 4)
    ki = iter(range(len(keys)))
    blocks = []
    for (cin, cout, K) in plan:
        fan_in = cin * K * K
        w = jax.random.normal(keys[next(ki)], (cout, cin, K, K), jnp.float32) / np.sqrt(fan_in)
        g = 1.0 + 0.05 * jax.random.normal(keys[next(ki)], (cout,), jnp.float32)
        b = 0.05 * jax.random.normal(keys[next(ki)], (cout,), jnp.float32)
        blocks.append((w, g, b))
    c_in_out = 2 ** (nlayers + 1)
    c_out_out = 4 * width
    w_out = jax.random.normal(keys[next(ki)], (c_out_out, c_in_out, 1, 1),
                              jnp.float32) / np.sqrt(c_in_out)
    g_out = 1.0 + 0.05 * jax.random.normal(keys[next(ki)], (c_out_out,), jnp.float32)
    b_out = 0.05 * jax.random.normal(keys[next(ki)], (c_out_out,), jnp.float32)
    # torch Linear(4*width, 2*width, bias=False): weight (2*width, 4*width); y = x @ W.T
    w_comp = jax.random.normal(keys[next(ki)], (2 * width, 4 * width),
                               jnp.float32) / np.sqrt(4 * width)
    return {'blocks': blocks,
            'out': (w_out, g_out, b_out),
            'w_comp': w_comp.T}               # (4*width, 2*width): mu | sigma columns


if __name__ == "__main__":
    width = 16      # power of two -> 3 conv blocks + output block, latent dim = width
    batch = 2       # >1 so the _SqueezeLayer BatchNorm1d branch is exercised
    key = jax.random.PRNGKey(0)
    kx, kp = jax.random.split(key)
    x = jax.random.normal(kx, (batch, 3, width, width), jnp.float32)  # NCHW like torch
    params = make_params(width, kp)

    fwd = jax.jit(encoder_forward)
    mu, sigma = fwd(x, params)
    jax.block_until_ready((mu, sigma))

    mu_ref, sigma_ref = reference_forward(x, params)
    np.testing.assert_allclose(np.asarray(mu), np.asarray(mu_ref), rtol=2e-2, atol=2e-2)
    np.testing.assert_allclose(np.asarray(sigma), np.asarray(sigma_ref), rtol=2e-2, atol=2e-2)
    assert mu.shape == (batch, width) and sigma.shape == (batch, width)

    print("KERNEL_OK")
</pallas_src>

<mosaic_0001>
module attributes {stable_mosaic.version = 11 : i64} {
  func.func @_conv_bn_relu_kernel(%arg0: i32, %arg1: memref<128x27xbf16, #tpu.memory_space<vmem>>, %arg2: memref<27x8xbf16, #tpu.memory_space<vmem>>, %arg3: memref<1x8xf32, #tpu.memory_space<vmem>>, %arg4: memref<1x8xf32, #tpu.memory_space<vmem>>, %arg5: memref<128x8xbf16, #tpu.memory_space<vmem>>, %arg6: memref<128x8xf32, #tpu.memory_space<vmem>>, %arg7: memref<1x8xf32, #tpu.memory_space<vmem>>) attributes {dimension_semantics = [#tpu.dimension_semantics<arbitrary>], iteration_bounds = array<i64: 1>, scalar_prefetch = 0 : i64, scratch_operands = 2 : i64, tpu.core_type = #tpu.core_type<tc>, window_params = [{transform_indices = @transform_0, window_bounds = array<i64: 128, 27>}, {pipeline_mode = #tpu.pipeline_mode<synchronous>, transform_indices = @transform_1, window_bounds = array<i64: 27, 8>}, {pipeline_mode = #tpu.pipeline_mode<synchronous>, transform_indices = @transform_2, window_bounds = array<i64: 1, 8>}, {pipeline_mode = #tpu.pipeline_mode<synchronous>, transform_indices = @transform_3, window_bounds = array<i64: 1, 8>}, {pipeline_mode = #tpu.pipeline_mode<synchronous>, transform_indices = @transform_4, window_bounds = array<i64: 128, 8>}]} {
    %c0_i32 = arith.constant 0 : i32
    %0 = arith.cmpi eq, %arg0, %c0_i32 : i32
    %1 = arith.extui %0 : i1 to i32
    %c0_i32_0 = arith.constant 0 : i32
    %2 = arith.cmpi ne, %1, %c0_i32_0 : i32
    scf.if %2 {
      %cst_12 = arith.constant 0.000000e+00 : f32
      %18 = vector.broadcast %cst_12 : f32 to vector<1x8xf32>
      %c0_13 = arith.constant 0 : index
      %c0_14 = arith.constant 0 : index
      %19 = vector.load %arg7[%c0_13, %c0_14] : memref<1x8xf32, #tpu.memory_space<vmem>>, vector<1x8xf32>
      tpu.vector_store %arg7[%c0_13, %c0_14], %18 {strides = array<i32>} : memref<1x8xf32, #tpu.memory_space<vmem>>, vector<1x8xf32>,
    } else {
    }
    %c0 = arith.constant 0 : index
    %c0_1 = arith.constant 0 : index
    %3 = vector.load %arg1[%c0, %c0_1] : memref<128x27xbf16, #tpu.memory_space<vmem>>, vector<128x27xbf16>
    %c0_2 = arith.constant 0 : index
    %c0_3 = arith.constant 0 : index
    %4 = vector.load %arg2[%c0_2, %c0_3] : memref<27x8xbf16, #tpu.memory_space<vmem>>, vector<27x8xbf16>
    %cst = arith.constant dense<0.000000e+00> : vector<128x8xf32>
    %5 = tpu.matmul %3, %4, %cst {dimension_numbers = #tpu.dot_dimension_numbers<[1], [0], [0], [1], [0, 0, 1, 1], [], []>} : vector<128x27xbf16>, vector<27x8xbf16>, vector<128x8xf32> -> vector<128x8xf32>
    %c128_i32 = arith.constant 128 : i32
    %6 = arith.muli %arg0, %c128_i32 : i32
    %7 = tpu.assume_multiple %6, 128 : i32
    %8 = arith.index_cast %7 : i32 to index
    %c0_4 = arith.constant 0 : index
    %9 = vector.load %arg6[%8, %c0_4] : memref<128x8xf32, #tpu.memory_space<vmem>>, vector<128x8xf32>
    tpu.vector_store %arg6[%8, %c0_4], %5 {strides = array<i32>} : memref<128x8xf32, #tpu.memory_space<vmem>>, vector<128x8xf32>,
    %c0_5 = arith.constant 0 : index
    %c0_6 = arith.constant 0 : index
    %10 = vector.load %arg7[%c0_5, %c0_6] : memref<1x8xf32, #tpu.memory_space<vmem>>, vector<1x8xf32>
    %cst_7 = arith.constant dense<0.000000e+00> : vector<8xf32>
    %11 = vector.multi_reduction <add>, %5, %cst_7 [0] : vector<128x8xf32> to vector<8xf32>
    %12 = vector.shape_cast %11 : vector<8xf32> to vector<1x8xf32>
    %13 = arith.addf %10, %12 : vector<1x8xf32>
    %c0_8 = arith.constant 0 : index
    %c0_9 = arith.constant 0 : index
    %14 = vector.load %arg7[%c0_8, %c0_9] : memref<1x8xf32, #tpu.memory_space<vmem>>, vector<1x8xf32>
    tpu.vector_store %arg7[%c0_8, %c0_9], %13 {strides = array<i32>} : memref<1x8xf32, #tpu.memory_space<vmem>>, vector<1x8xf32>,
    %c0_i32_10 = arith.constant 0 : i32
    %15 = arith.cmpi eq, %arg0, %c0_i32_10 : i32
    %16 = arith.extui %15 : i1 to i32
    %c0_i32_11 = arith.constant 0 : i32
    %17 = arith.cmpi ne, %16, %c0_i32_11 : i32
    scf.if %17 {
      %c0_12 = arith.constant 0 : index
      %c0_13 = arith.constant 0 : index
      %18 = vector.load %arg7[%c0_12, %c0_13] : memref<1x8xf32, #tpu.memory_space<vmem>>, vector<1x8xf32>
      %cst_14 = arith.constant 7.812500e-03 : f32
      %19 = vector.broadcast %cst_14 : f32 to vector<1x8xf32>
      %20 = arith.mulf %18, %19 : vector<1x8xf32>
      %c0_15 = arith.constant 0 : index
      %c0_16 = arith.constant 0 : index
      %21 = vector.load %arg6[%c0_15, %c0_16] : memref<128x8xf32, #tpu.memory_space<vmem>>, vector<128x8xf32>
      %22 = tpu.iota {dimensions = array<i32: 0>} : vector<128x8xi32>
      %c128_i32_17 = arith.constant 128 : i32
      %23 = vector.broadcast %c128_i32_17 : i32 to vector<128x8xi32>
      %24 = arith.cmpi slt, %22, %23 : vector<128x8xi32>
      %25 = vector.broadcast %20 : vector<1x8xf32> to vector<128x8xf32>
      %26 = arith.subf %21, %25 : vector<128x8xf32>
      %cst_18 = arith.constant 0.000000e+00 : f32
      %27 = vector.broadcast %cst_18 : f32 to vector<128x8xf32>
      %28 = arith.select %24, %26, %27 : vector<128x8xi1>, vector<128x8xf32>
      %29 = arith.mulf %28, %28 : vector<128x8xf32>
      %cst_19 = arith.constant dense<0.000000e+00> : vector<8xf32>
      %30 = vector.multi_reduction <add>, %29, %cst_19 [0] : vector<128x8xf32> to vector<8xf32>
      %31 = vector.shape_cast %30 : vector<8xf32> to vector<1x8xf32>
      %cst_20 = arith.constant 7.812500e-03 : f32
      %32 = vector.broadcast %cst_20 : f32 to vector<1x8xf32>
      %33 = arith.mulf %31, %32 : vector<1x8xf32>
      %c0_21 = arith.constant 0 : index
      %c0_22 = arith.constant 0 : index
      %34 = vector.load %arg3[%c0_21, %c0_22] : memref<1x8xf32, #tpu.memory_space<vmem>>, vector<1x8xf32>
      %cst_23 = arith.constant 9.99999974E-6 : f32
      %35 = vector.broadcast %cst_23 : f32 to vector<1x8xf32>
      %36 = arith.addf %33, %35 : vector<1x8xf32>
      %37 = math.rsqrt %36 : vector<1x8xf32>
      %38 = arith.mulf %34, %37 : vector<1x8xf32>
      %c0_24 = arith.constant 0 : index
      %c0_25 = arith.constant 0 : index
      %39 = vector.load %arg4[%c0_24, %c0_25] : memref<1x8xf32, #tpu.memory_space<vmem>>, vector<1x8xf32>
      %40 = arith.mulf %20, %38 : vector<1x8xf32>
      %41 = arith.subf %39, %40 : vector<1x8xf32>
      %42 = vector.broadcast %38 : vector<1x8xf32> to vector<128x8xf32>
      %43 = arith.mulf %21, %42 : vector<128x8xf32>
      %44 = vector.broadcast %41 : vector<1x8xf32> to vector<128x8xf32>
      %45 = arith.addf %43, %44 : vector<128x8xf32>
      %cst_26 = arith.constant 0.000000e+00 : f32
      %46 = vector.broadcast %cst_26 : f32 to vector<128x8xf32>
      %47 = arith.maximumf %45, %46 : vector<128x8xf32>
      %48 = arith.truncf %47 : vector<128x8xf32> to vector<128x8xbf16>
      %c0_27 = arith.constant 0 : index
      %c0_28 = arith.constant 0 : index
      %49 = vector.load %arg5[%c0_27, %c0_28] : memref<128x8xbf16, #tpu.memory_space<vmem>>, vector<128x8xbf16>
      tpu.vector_store %arg5[%c0_27, %c0_28], %48 {strides = array<i32>} : memref<128x8xbf16, #tpu.memory_space<vmem>>, vector<128x8xbf16>,
    } else {
    }
    return
  }
  func.func @transform_0(%arg0: i32) -> (i32, i32) {
    %c0_i32 = arith.constant 0 : i32
    %c0_i32_0 = arith.constant 0 : i32
    return %arg0, %c0_i32 : i32, i32
  }
  func.func @transform_1(%arg0: i32) -> (i32, i32) {
    %c0_i32 = arith.constant 0 : i32
    %c0_i32_0 = arith.constant 0 : i32
    %c0_i32_1 = arith.constant 0 : i32
    return %c0_i32, %c0_i32_0 : i32, i32
  }
  func.func @transform_2(%arg0: i32) -> (i32, i32) {
    %c0_i32 = arith.constant 0 : i32
    %c0_i32_0 = arith.constant 0 : i32
    %c0_i32_1 = arith.constant 0 : i32
    return %c0_i32, %c0_i32_0 : i32, i32
  }
  func.func @transform_3(%arg0: i32) -> (i32, i32) {
    %c0_i32 = arith.constant 0 : i32
    %c0_i32_0 = arith.constant 0 : i32
    %c0_i32_1 = arith.constant 0 : i32
    return %c0_i32, %c0_i32_0 : i32, i32
  }
  func.func @transform_4(%arg0: i32) -> (i32, i32) {
    %c0_i32 = arith.constant 0 : i32
    %c0_i32_0 = arith.constant 0 : i32
    %c0_i32_1 = arith.constant 0 : i32
    return %c0_i32, %c0_i32_0 : i32, i32
  }
}

module attributes {stable_mosaic.version = 11 : i64} {
  func.func @_conv_bn_relu_kernel(%arg0: i32, %arg1: memref<32x72xbf16, #tpu.memory_space<vmem>>, %arg2: memref<72x16xbf16, #tpu.memory_space<vmem>>, %arg3: memref<1x16xf32, #tpu.memory_space<vmem>>, %arg4: memref<1x16xf32, #tpu.memory_space<vmem>>, %arg5: memref<32x16xbf16, #tpu.memory_space<vmem>>, %arg6: memref<32x16xf32, #tpu.memory_space<vmem>>, %arg7: memref<1x16xf32, #tpu.memory_space<vmem>>) attributes {dimension_semantics = [#tpu.dimension_semantics<arbitrary>], iteration_bounds = array<i64: 1>, scalar_prefetch = 0 : i64, scratch_operands = 2 : i64, tpu.core_type = #tpu.core_type<tc>, window_params = [{transform_indices = @transform_0, window_bounds = array<i64: 32, 72>}, {pipeline_mode = #tpu.pipeline_mode<synchronous>, transform_indices = @transform_1, window_bounds = array<i64: 72, 16>}, {pipeline_mode = #tpu.pipeline_mode<synchronous>, transform_indices = @transform_2, window_bounds = array<i64: 1, 16>}, {pipeline_mode = #tpu.pipeline_mode<synchronous>, transform_indices = @transform_3, window_bounds = array<i64: 1, 16>}, {pipeline_mode = #tpu.pipeline_mode<synchronous>, transform_indices = @transform_4, window_bounds = array<i64: 32, 16>}]} {
    %c0_i32 = arith.constant 0 : i32
    %0 = arith.cmpi eq, %arg0, %c0_i32 : i32
    %1 = arith.extui %0 : i1 to i32
    %c0_i32_0 = arith.constant 0 : i32
    %2 = arith.cmpi ne, %1, %c0_i32_0 : i32
    scf.if %2 {
      %cst_12 = arith.constant 0.000000e+00 : f32
      %18 = vector.broadcast %cst_12 : f32 to vector<1x16xf32>
      %c0_13 = arith.constant 0 : index
      %c0_14 = arith.constant 0 : index
      %19 = vector.load %arg7[%c0_13, %c0_14] : memref<1x16xf32, #tpu.memory_space<vmem>>, vector<1x16xf32>
      tpu.vector_store %arg7[%c0_13, %c0_14], %18 {strides = array<i32>} : memref<1x16xf32, #tpu.memory_space<vmem>>, vector<1x16xf32>,
    } else {
    }
    %c0 = arith.constant 0 : index
    %c0_1 = arith.constant 0 : index
    %3 = vector.load %arg1[%c0, %c0_1] : memref<32x72xbf16, #tpu.memory_space<vmem>>, vector<32x72xbf16>
    %c0_2 = arith.constant 0 : index
    %c0_3 = arith.constant 0 : index
    %4 = vector.load %arg2[%c0_2, %c0_3] : memref<72x16xbf16, #tpu.memory_space<vmem>>, vector<72x16xbf16>
    %cst = arith.constant dense<0.000000e+00> : vector<32x16xf32>
    %5 = tpu.matmul %3, %4, %cst {dimension_numbers = #tpu.dot_dimension_numbers<[1], [0], [0], [1], [0, 0, 1, 1], [], []>} : vector<32x72xbf16>, vector<72x16xbf16>, vector<32x16xf32> -> vector<32x16xf32>
    %c32_i32 = arith.constant 32 : i32
    %6 = arith.muli %arg0, %c32_i32 : i32
    %7 = tpu.assume_multiple %6, 32 : i32
    %8 = arith.index_cast %7 : i32 to index
    %c0_4 = arith.constant 0 : index
    %9 = vector.load %arg6[%8, %c0_4] : memref<32x16xf32, #tpu.memory_space<vmem>>, vector<32x16xf32>
    tpu.vector_store %arg6[%8, %c0_4], %5 {strides = array<i32>} : memref<32x16xf32, #tpu.memory_space<vmem>>, vector<32x16xf32>,
    %c0_5 = arith.constant 0 : index
    %c0_6 = arith.constant 0 : index
    %10 = vector.load %arg7[%c0_5, %c0_6] : memref<1x16xf32, #tpu.memory_space<vmem>>, vector<1x16xf32>
    %cst_7 = arith.constant dense<0.000000e+00> : vector<16xf32>
    %11 = vector.multi_reduction <add>, %5, %cst_7 [0] : vector<32x16xf32> to vector<16xf32>
    %12 = vector.shape_cast %11 : vector<16xf32> to vector<1x16xf32>
    %13 = arith.addf %10, %12 : vector<1x16xf32>
    %c0_8 = arith.constant 0 : index
    %c0_9 = arith.constant 0 : index
    %14 = vector.load %arg7[%c0_8, %c0_9] : memref<1x16xf32, #tpu.memory_space<vmem>>, vector<1x16xf32>
    tpu.vector_store %arg7[%c0_8, %c0_9], %13 {strides = array<i32>} : memref<1x16xf32, #tpu.memory_space<vmem>>, vector<1x16xf32>,
    %c0_i32_10 = arith.constant 0 : i32
    %15 = arith.cmpi eq, %arg0, %c0_i32_10 : i32
    %16 = arith.extui %15 : i1 to i32
    %c0_i32_11 = arith.constant 0 : i32
    %17 = arith.cmpi ne, %16, %c0_i32_11 : i32
    scf.if %17 {
      %c0_12 = arith.constant 0 : index
      %c0_13 = arith.constant 0 : index
      %18 = vector.load %arg7[%c0_12, %c0_13] : memref<1x16xf32, #tpu.memory_space<vmem>>, vector<1x16xf32>
      %cst_14 = arith.constant 3.125000e-02 : f32
      %19 = vector.broadcast %cst_14 : f32 to vector<1x16xf32>
      %20 = arith.mulf %18, %19 : vector<1x16xf32>
      %c0_15 = arith.constant 0 : index
      %c0_16 = arith.constant 0 : index
      %21 = vector.load %arg6[%c0_15, %c0_16] : memref<32x16xf32, #tpu.memory_space<vmem>>, vector<32x16xf32>
      %22 = tpu.iota {dimensions = array<i32: 0>} : vector<32x16xi32>
      %c32_i32_17 = arith.constant 32 : i32
      %23 = vector.broadcast %c32_i32_17 : i32 to vector<32x16xi32>
      %24 = arith.cmpi slt, %22, %23 : vector<32x16xi32>
      %25 = vector.broadcast %20 : vector<1x16xf32> to vector<32x16xf32>
      %26 = arith.subf %21, %25 : vector<32x16xf32>
      %cst_18 = arith.constant 0.000000e+00 : f32
      %27 = vector.broadcast %cst_18 : f32 to vector<32x16xf32>
      %28 = arith.select %24, %26, %27 : vector<32x16xi1>, vector<32x16xf32>
      %29 = arith.mulf %28, %28 : vector<32x16xf32>
      %cst_19 = arith.constant dense<0.000000e+00> : vector<16xf32>
      %30 = vector.multi_reduction <add>, %29, %cst_19 [0] : vector<32x16xf32> to vector<16xf32>
      %31 = vector.shape_cast %30 : vector<16xf32> to vector<1x16xf32>
      %cst_20 = arith.constant 3.125000e-02 : f32
      %32 = vector.broadcast %cst_20 : f32 to vector<1x16xf32>
      %33 = arith.mulf %31, %32 : vector<1x16xf32>
      %c0_21 = arith.constant 0 : index
      %c0_22 = arith.constant 0 : index
      %34 = vector.load %arg3[%c0_21, %c0_22] : memref<1x16xf32, #tpu.memory_space<vmem>>, vector<1x16xf32>
      %cst_23 = arith.constant 9.99999974E-6 : f32
      %35 = vector.broadcast %cst_23 : f32 to vector<1x16xf32>
      %36 = arith.addf %33, %35 : vector<1x16xf32>
      %37 = math.rsqrt %36 : vector<1x16xf32>
      %38 = arith.mulf %34, %37 : vector<1x16xf32>
      %c0_24 = arith.constant 0 : index
      %c0_25 = arith.constant 0 : index
      %39 = vector.load %arg4[%c0_24, %c0_25] : memref<1x16xf32, #tpu.memory_space<vmem>>, vector<1x16xf32>
      %40 = arith.mulf %20, %38 : vector<1x16xf32>
      %41 = arith.subf %39, %40 : vector<1x16xf32>
      %42 = vector.broadcast %38 : vector<1x16xf32> to vector<32x16xf32>
      %43 = arith.mulf %21, %42 : vector<32x16xf32>
      %44 = vector.broadcast %41 : vector<1x16xf32> to vector<32x16xf32>
      %45 = arith.addf %43, %44 : vector<32x16xf32>
      %cst_26 = arith.constant 0.000000e+00 : f32
      %46 = vector.broadcast %cst_26 : f32 to vector<32x16xf32>
      %47 = arith.maximumf %45, %46 : vector<32x16xf32>
      %48 = arith.truncf %47 : vector<32x16xf32> to vector<32x16xbf16>
      %c0_27 = arith.constant 0 : index
      %c0_28 = arith.constant 0 : index
      %49 = vector.load %arg5[%c0_27, %c0_28] : memref<32x16xbf16, #tpu.memory_space<vmem>>, vector<32x16xbf16>
      tpu.vector_store %arg5[%c0_27, %c0_28], %48 {strides = array<i32>} : memref<32x16xbf16, #tpu.memory_space<vmem>>, vector<32x16xbf16>,
    } else {
    }
    return
  }
  func.func @transform_0(%arg0: i32) -> (i32, i32) {
    %c0_i32 = arith.constant 0 : i32
    %c0_i32_0 = arith.constant 0 : i32
    return %arg0, %c0_i32 : i32, i32
  }
  func.func @transform_1(%arg0: i32) -> (i32, i32) {
    %c0_i32 = arith.constant 0 : i32
    %c0_i32_0 = arith.constant 0 : i32
    %c0_i32_1 = arith.constant 0 : i32
    return %c0_i32, %c0_i32_0 : i32, i32
  }
  func.func @transform_2(%arg0: i32) -> (i32, i32) {
    %c0_i32 = arith.constant 0 : i32
    %c0_i32_0 = arith.constant 0 : i32
    %c0_i32_1 = arith.constant 0 : i32
    return %c0_i32, %c0_i32_0 : i32, i32
  }
  func.func @transform_3(%arg0: i32) -> (i32, i32) {
    %c0_i32 = arith.constant 0 : i32
    %c0_i32_0 = arith.constant 0 : i32
    %c0_i32_1 = arith.constant 0 : i32
    return %c0_i32, %c0_i32_0 : i32, i32
  }
  func.func @transform_4(%arg0: i32) -> (i32, i32) {
    %c0_i32 = arith.constant 0 : i32
    %c0_i32_0 = arith.constant 0 : i32
    %c0_i32_1 = arith.constant 0 : i32
    return %c0_i32, %c0_i32_0 : i32, i32
  }
}

module attributes {stable_mosaic.version = 11 : i64} {
  func.func @_head_kernel(%arg0: i32, %arg1: memref<2x32xbf16, #tpu.memory_space<vmem>>, %arg2: memref<32x64xbf16, #tpu.memory_space<vmem>>, %arg3: memref<1x64xf32, #tpu.memory_space<vmem>>, %arg4: memref<1x64xf32, #tpu.memory_space<vmem>>, %arg5: memref<64x32xbf16, #tpu.memory_space<vmem>>, %arg6: memref<2x16xf32, #tpu.memory_space<vmem>>, %arg7: memref<2x16xf32, #tpu.memory_space<vmem>>) attributes {dimension_semantics = [#tpu.dimension_semantics<arbitrary>], iteration_bounds = array<i64: 1>, scalar_prefetch = 0 : i64, scratch_operands = 0 : i64, tpu.core_type = #tpu.core_type<tc>, window_params = [{pipeline_mode = #tpu.pipeline_mode<synchronous>, transform_indices = @transform_0, window_bounds = array<i64: 2, 32>}, {pipeline_mode = #tpu.pipeline_mode<synchronous>, transform_indices = @transform_1, window_bounds = array<i64: 32, 64>}, {pipeline_mode = #tpu.pipeline_mode<synchronous>, transform_indices = @transform_2, window_bounds = array<i64: 1, 64>}, {pipeline_mode = #tpu.pipeline_mode<synchronous>, transform_indices = @transform_3, window_bounds = array<i64: 1, 64>}, {pipeline_mode = #tpu.pipeline_mode<synchronous>, transform_indices = @transform_4, window_bounds = array<i64: 64, 32>}, {pipeline_mode = #tpu.pipeline_mode<synchronous>, transform_indices = @transform_5, window_bounds = array<i64: 2, 16>}, {pipeline_mode = #tpu.pipeline_mode<synchronous>, transform_indices = @transform_6, window_bounds = array<i64: 2, 16>}]} {
    %c0 = arith.constant 0 : index
    %c0_0 = arith.constant 0 : index
    %0 = vector.load %arg1[%c0, %c0_0] : memref<2x32xbf16, #tpu.memory_space<vmem>>, vector<2x32xbf16>
    %c0_1 = arith.constant 0 : index
    %c0_2 = arith.constant 0 : index
    %1 = vector.load %arg2[%c0_1, %c0_2] : memref<32x64xbf16, #tpu.memory_space<vmem>>, vector<32x64xbf16>
    %cst = arith.constant dense<0.000000e+00> : vector<2x64xf32>
    %2 = tpu.matmul %0, %1, %cst {dimension_numbers = #tpu.dot_dimension_numbers<[1], [0], [0], [1], [0, 0, 1, 1], [], []>} : vector<2x32xbf16>, vector<32x64xbf16>, vector<2x64xf32> -> vector<2x64xf32>
    %cst_3 = arith.constant dense<0.000000e+00> : vector<64xf32>
    %3 = vector.multi_reduction <add>, %2, %cst_3 [0] : vector<2x64xf32> to vector<64xf32>
    %4 = vector.shape_cast %3 : vector<64xf32> to vector<1x64xf32>
    %cst_4 = arith.constant 2.000000e+00 : f32
    %5 = vector.broadcast %cst_4 : f32 to vector<1x64xf32>
    %6 = arith.divf %4, %5 : vector<1x64xf32>
    %7 = vector.broadcast %6 : vector<1x64xf32> to vector<2x64xf32>
    %8 = arith.subf %2, %7 : vector<2x64xf32>
    %9 = arith.mulf %8, %8 : vector<2x64xf32>
    %cst_5 = arith.constant dense<0.000000e+00> : vector<64xf32>
    %10 = vector.multi_reduction <add>, %9, %cst_5 [0] : vector<2x64xf32> to vector<64xf32>
    %11 = vector.shape_cast %10 : vector<64xf32> to vector<1x64xf32>
    %cst_6 = arith.constant 2.000000e+00 : f32
    %12 = vector.broadcast %cst_6 : f32 to vector<1x64xf32>
    %13 = arith.divf %11, %12 : vector<1x64xf32>
    %14 = vector.broadcast %6 : vector<1x64xf32> to vector<2x64xf32>
    %15 = arith.subf %2, %14 : vector<2x64xf32>
    %cst_7 = arith.constant 9.99999974E-6 : f32
    %16 = vector.broadcast %cst_7 : f32 to vector<1x64xf32>
    %17 = arith.addf %13, %16 : vector<1x64xf32>
    %18 = math.rsqrt %17 : vector<1x64xf32>
    %19 = vector.broadcast %18 : vector<1x64xf32> to vector<2x64xf32>
    %20 = arith.mulf %15, %19 : vector<2x64xf32>
    %c0_8 = arith.constant 0 : index
    %c0_9 = arith.constant 0 : index
    %21 = vector.load %arg3[%c0_8, %c0_9] : memref<1x64xf32, #tpu.memory_space<vmem>>, vector<1x64xf32>
    %22 = vector.broadcast %21 : vector<1x64xf32> to vector<2x64xf32>
    %23 = arith.mulf %20, %22 : vector<2x64xf32>
    %c0_10 = arith.constant 0 : index
    %c0_11 = arith.constant 0 : index
    %24 = vector.load %arg4[%c0_10, %c0_11] : memref<1x64xf32, #tpu.memory_space<vmem>>, vector<1x64xf32>
    %25 = vector.broadcast %24 : vector<1x64xf32> to vector<2x64xf32>
    %26 = arith.addf %23, %25 : vector<2x64xf32>
    %cst_12 = arith.constant 0.000000e+00 : f32
    %27 = vector.broadcast %cst_12 : f32 to vector<2x64xf32>
    %28 = arith.maximumf %26, %27 : vector<2x64xf32>
    %29 = arith.truncf %28 : vector<2x64xf32> to vector<2x64xbf16>
    %c0_13 = arith.constant 0 : index
    %c0_14 = arith.constant 0 : index
    %30 = vector.load %arg5[%c0_13, %c0_14] : memref<64x32xbf16, #tpu.memory_space<vmem>>, vector<64x32xbf16>
    %cst_15 = arith.constant dense<0.000000e+00> : vector<2x32xf32>
    %31 = tpu.matmul %29, %30, %cst_15 {dimension_numbers = #tpu.dot_dimension_numbers<[1], [0], [0], [1], [0, 0, 1, 1], [], []>} : vector<2x64xbf16>, vector<64x32xbf16>, vector<2x32xf32> -> vector<2x32xf32>
    %32 = vector.extract_strided_slice %31 {offsets = [0, 0], sizes = [2, 16], strides = [1, 1]} : vector<2x32xf32> to vector<2x16xf32>
    %c0_16 = arith.constant 0 : index
    %c0_17 = arith.constant 0 : index
    %33 = vector.load %arg6[%c0_16, %c0_17] : memref<2x16xf32, #tpu.memory_space<vmem>>, vector<2x16xf32>
    tpu.vector_store %arg6[%c0_16, %c0_17], %32 {strides = array<i32>} : memref<2x16xf32, #tpu.memory_space<vmem>>, vector<2x16xf32>,
    %34 = vector.extract_strided_slice %31 {offsets = [0, 16], sizes = [2, 16], strides = [1, 1]} : vector<2x32xf32> to vector<2x16xf32>
    %cst_18 = arith.constant 2.000000e+01 : f32
    %35 = vector.broadcast %cst_18 : f32 to vector<2x16xf32>
    %36 = arith.cmpf ogt, %34, %35 : vector<2x16xf32>
    %37 = math.exp %34 : vector<2x16xf32>
    %38 = math.exp %34 : vector<2x16xf32>
    %cst_19 = arith.constant 1.000000e+00 : f32
    %39 = vector.broadcast %cst_19 : f32 to vector<2x16xf32>
    %40 = arith.addf %39, %38 : vector<2x16xf32>
    %41 = arith.select %36, %37, %40 : vector<2x16xi1>, vector<2x16xf32>
    %c0_20 = arith.constant 0 : index
    %c0_21 = arith.constant 0 : index
    %42 = vector.load %arg7[%c0_20, %c0_21] : memref<2x16xf32, #tpu.memory_space<vmem>>, vector<2x16xf32>
    tpu.vector_store %arg7[%c0_20, %c0_21], %41 {strides = array<i32>} : memref<2x16xf32, #tpu.memory_space<vmem>>, vector<2x16xf32>,
    return
  }
  func.func @transform_0(%arg0: i32) -> (i32, i32) {
    %c0_i32 = arith.constant 0 : i32
    %c0_i32_0 = arith.constant 0 : i32
    %c0_i32_1 = arith.constant 0 : i32
    return %c0_i32, %c0_i32_0 : i32, i32
  }
  func.func @transform_1(%arg0: i32) -> (i32, i32) {
    %c0_i32 = arith.constant 0 : i32
    %c0_i32_0 = arith.constant 0 : i32
    %c0_i32_1 = arith.constant 0 : i32
    return %c0_i32, %c0_i32_0 : i32, i32
  }
  func.func @transform_2(%arg0: i32) -> (i32, i32) {
    %c0_i32 = arith.constant 0 : i32
    %c0_i32_0 = arith.constant 0 : i32
    %c0_i32_1 = arith.constant 0 : i32
    return %c0_i32, %c0_i32_0 : i32, i32
  }
  func.func @transform_3(%arg0: i32) -> (i32, i32) {
    %c0_i32 = arith.constant 0 : i32
    %c0_i32_0 = arith.constant 0 : i32
    %c0_i32_1 = arith.constant 0 : i32
    return %c0_i32, %c0_i32_0 : i32, i32
  }
  func.func @transform_4(%arg0: i32) -> (i32, i32) {
    %c0_i32 = arith.constant 0 : i32
    %c0_i32_0 = arith.constant 0 : i32
    %c0_i32_1 = arith.constant 0 : i32
    return %c0_i32, %c0_i32_0 : i32, i32
  }
  func.func @transform_5(%arg0: i32) -> (i32, i32) {
    %c0_i32 = arith.constant 0 : i32
    %c0_i32_0 = arith.constant 0 : i32
    %c0_i32_1 = arith.constant 0 : i32
    return %c0_i32, %c0_i32_0 : i32, i32
  }
  func.func @transform_6(%arg0: i32) -> (i32, i32) {
    %c0_i32 = arith.constant 0 : i32
    %c0_i32_0 = arith.constant 0 : i32
    %c0_i32_1 = arith.constant 0 : i32
    return %c0_i32, %c0_i32_0 : i32, i32
  }
}

module attributes {stable_mosaic.version = 11 : i64} {
  func.func @_conv_bn_relu_kernel(%arg0: i32, %arg1: memref<8x144xbf16, #tpu.memory_space<vmem>>, %arg2: memref<144x32xbf16, #tpu.memory_space<vmem>>, %arg3: memref<1x32xf32, #tpu.memory_space<vmem>>, %arg4: memref<1x32xf32, #tpu.memory_space<vmem>>, %arg5: memref<8x32xbf16, #tpu.memory_space<vmem>>, %arg6: memref<8x32xf32, #tpu.memory_space<vmem>>, %arg7: memref<1x32xf32, #tpu.memory_space<vmem>>) attributes {dimension_semantics = [#tpu.dimension_semantics<arbitrary>], iteration_bounds = array<i64: 1>, scalar_prefetch = 0 : i64, scratch_operands = 2 : i64, tpu.core_type = #tpu.core_type<tc>, window_params = [{transform_indices = @transform_0, window_bounds = array<i64: 8, 144>}, {pipeline_mode = #tpu.pipeline_mode<synchronous>, transform_indices = @transform_1, window_bounds = array<i64: 144, 32>}, {pipeline_mode = #tpu.pipeline_mode<synchronous>, transform_indices = @transform_2, window_bounds = array<i64: 1, 32>}, {pipeline_mode = #tpu.pipeline_mode<synchronous>, transform_indices = @transform_3, window_bounds = array<i64: 1, 32>}, {pipeline_mode = #tpu.pipeline_mode<synchronous>, transform_indices = @transform_4, window_bounds = array<i64: 8, 32>}]} {
    %c0_i32 = arith.constant 0 : i32
    %0 = arith.cmpi eq, %arg0, %c0_i32 : i32
    %1 = arith.extui %0 : i1 to i32
    %c0_i32_0 = arith.constant 0 : i32
    %2 = arith.cmpi ne, %1, %c0_i32_0 : i32
    scf.if %2 {
      %cst_12 = arith.constant 0.000000e+00 : f32
      %18 = vector.broadcast %cst_12 : f32 to vector<1x32xf32>
      %c0_13 = arith.constant 0 : index
      %c0_14 = arith.constant 0 : index
      %19 = vector.load %arg7[%c0_13, %c0_14] : memref<1x32xf32, #tpu.memory_space<vmem>>, vector<1x32xf32>
      tpu.vector_store %arg7[%c0_13, %c0_14], %18 {strides = array<i32>} : memref<1x32xf32, #tpu.memory_space<vmem>>, vector<1x32xf32>,
    } else {
    }
    %c0 = arith.constant 0 : index
    %c0_1 = arith.constant 0 : index
    %3 = vector.load %arg1[%c0, %c0_1] : memref<8x144xbf16, #tpu.memory_space<vmem>>, vector<8x144xbf16>
    %c0_2 = arith.constant 0 : index
    %c0_3 = arith.constant 0 : index
    %4 = vector.load %arg2[%c0_2, %c0_3] : memref<144x32xbf16, #tpu.memory_space<vmem>>, vector<144x32xbf16>
    %cst = arith.constant dense<0.000000e+00> : vector<8x32xf32>
    %5 = tpu.matmul %3, %4, %cst {dimension_numbers = #tpu.dot_dimension_numbers<[1], [0], [0], [1], [0, 0, 1, 1], [], []>} : vector<8x144xbf16>, vector<144x32xbf16>, vector<8x32xf32> -> vector<8x32xf32>
    %c8_i32 = arith.constant 8 : i32
    %6 = arith.muli %arg0, %c8_i32 : i32
    %7 = tpu.assume_multiple %6, 8 : i32
    %8 = arith.index_cast %7 : i32 to index
    %c0_4 = arith.constant 0 : index
    %9 = vector.load %arg6[%8, %c0_4] : memref<8x32xf32, #tpu.memory_space<vmem>>, vector<8x32xf32>
    tpu.vector_store %arg6[%8, %c0_4], %5 {strides = array<i32>} : memref<8x32xf32, #tpu.memory_space<vmem>>, vector<8x32xf32>,
    %c0_5 = arith.constant 0 : index
    %c0_6 = arith.constant 0 : index
    %10 = vector.load %arg7[%c0_5, %c0_6] : memref<1x32xf32, #tpu.memory_space<vmem>>, vector<1x32xf32>
    %cst_7 = arith.constant dense<0.000000e+00> : vector<32xf32>
    %11 = vector.multi_reduction <add>, %5, %cst_7 [0] : vector<8x32xf32> to vector<32xf32>
    %12 = vector.shape_cast %11 : vector<32xf32> to vector<1x32xf32>
    %13 = arith.addf %10, %12 : vector<1x32xf32>
    %c0_8 = arith.constant 0 : index
    %c0_9 = arith.constant 0 : index
    %14 = vector.load %arg7[%c0_8, %c0_9] : memref<1x32xf32, #tpu.memory_space<vmem>>, vector<1x32xf32>
    tpu.vector_store %arg7[%c0_8, %c0_9], %13 {strides = array<i32>} : memref<1x32xf32, #tpu.memory_space<vmem>>, vector<1x32xf32>,
    %c0_i32_10 = arith.constant 0 : i32
    %15 = arith.cmpi eq, %arg0, %c0_i32_10 : i32
    %16 = arith.extui %15 : i1 to i32
    %c0_i32_11 = arith.constant 0 : i32
    %17 = arith.cmpi ne, %16, %c0_i32_11 : i32
    scf.if %17 {
      %c0_12 = arith.constant 0 : index
      %c0_13 = arith.constant 0 : index
      %18 = vector.load %arg7[%c0_12, %c0_13] : memref<1x32xf32, #tpu.memory_space<vmem>>, vector<1x32xf32>
      %cst_14 = arith.constant 1.250000e-01 : f32
      %19 = vector.broadcast %cst_14 : f32 to vector<1x32xf32>
      %20 = arith.mulf %18, %19 : vector<1x32xf32>
      %c0_15 = arith.constant 0 : index
      %c0_16 = arith.constant 0 : index
      %21 = vector.load %arg6[%c0_15, %c0_16] : memref<8x32xf32, #tpu.memory_space<vmem>>, vector<8x32xf32>
      %22 = tpu.iota {dimensions = array<i32: 0>} : vector<8x32xi32>
      %c8_i32_17 = arith.constant 8 : i32
      %23 = vector.broadcast %c8_i32_17 : i32 to vector<8x32xi32>
      %24 = arith.cmpi slt, %22, %23 : vector<8x32xi32>
      %25 = vector.broadcast %20 : vector<1x32xf32> to vector<8x32xf32>
      %26 = arith.subf %21, %25 : vector<8x32xf32>
      %cst_18 = arith.constant 0.000000e+00 : f32
      %27 = vector.broadcast %cst_18 : f32 to vector<8x32xf32>
      %28 = arith.select %24, %26, %27 : vector<8x32xi1>, vector<8x32xf32>
      %29 = arith.mulf %28, %28 : vector<8x32xf32>
      %cst_19 = arith.constant dense<0.000000e+00> : vector<32xf32>
      %30 = vector.multi_reduction <add>, %29, %cst_19 [0] : vector<8x32xf32> to vector<32xf32>
      %31 = vector.shape_cast %30 : vector<32xf32> to vector<1x32xf32>
      %cst_20 = arith.constant 1.250000e-01 : f32
      %32 = vector.broadcast %cst_20 : f32 to vector<1x32xf32>
      %33 = arith.mulf %31, %32 : vector<1x32xf32>
      %c0_21 = arith.constant 0 : index
      %c0_22 = arith.constant 0 : index
      %34 = vector.load %arg3[%c0_21, %c0_22] : memref<1x32xf32, #tpu.memory_space<vmem>>, vector<1x32xf32>
      %cst_23 = arith.constant 9.99999974E-6 : f32
      %35 = vector.broadcast %cst_23 : f32 to vector<1x32xf32>
      %36 = arith.addf %33, %35 : vector<1x32xf32>
      %37 = math.rsqrt %36 : vector<1x32xf32>
      %38 = arith.mulf %34, %37 : vector<1x32xf32>
      %c0_24 = arith.constant 0 : index
      %c0_25 = arith.constant 0 : index
      %39 = vector.load %arg4[%c0_24, %c0_25] : memref<1x32xf32, #tpu.memory_space<vmem>>, vector<1x32xf32>
      %40 = arith.mulf %20, %38 : vector<1x32xf32>
      %41 = arith.subf %39, %40 : vector<1x32xf32>
      %42 = vector.broadcast %38 : vector<1x32xf32> to vector<8x32xf32>
      %43 = arith.mulf %21, %42 : vector<8x32xf32>
      %44 = vector.broadcast %41 : vector<1x32xf32> to vector<8x32xf32>
      %45 = arith.addf %43, %44 : vector<8x32xf32>
      %cst_26 = arith.constant 0.000000e+00 : f32
      %46 = vector.broadcast %cst_26 : f32 to vector<8x32xf32>
      %47 = arith.maximumf %45, %46 : vector<8x32xf32>
      %48 = arith.truncf %47 : vector<8x32xf32> to vector<8x32xbf16>
      %c0_27 = arith.constant 0 : index
      %c0_28 = arith.constant 0 : index
      %49 = vector.load %arg5[%c0_27, %c0_28] : memref<8x32xbf16, #tpu.memory_space<vmem>>, vector<8x32xbf16>
      tpu.vector_store %arg5[%c0_27, %c0_28], %48 {strides = array<i32>} : memref<8x32xbf16, #tpu.memory_space<vmem>>, vector<8x32xbf16>,
    } else {
    }
    return
  }
  func.func @transform_0(%arg0: i32) -> (i32, i32) {
    %c0_i32 = arith.constant 0 : i32
    %c0_i32_0 = arith.constant 0 : i32
    return %arg0, %c0_i32 : i32, i32
  }
  func.func @transform_1(%arg0: i32) -> (i32, i32) {
    %c0_i32 = arith.constant 0 : i32
    %c0_i32_0 = arith.constant 0 : i32
    %c0_i32_1 = arith.constant 0 : i32
    return %c0_i32, %c0_i32_0 : i32, i32
  }
  func.func @transform_2(%arg0: i32) -> (i32, i32) {
    %c0_i32 = arith.constant 0 : i32
    %c0_i32_0 = arith.constant 0 : i32
    %c0_i32_1 = arith.constant 0 : i32
    return %c0_i32, %c0_i32_0 : i32, i32
  }
  func.func @transform_3(%arg0: i32) -> (i32, i32) {
    %c0_i32 = arith.constant 0 : i32
    %c0_i32_0 = arith.constant 0 : i32
    %c0_i32_1 = arith.constant 0 : i32
    return %c0_i32, %c0_i32_0 : i32, i32
  }
  func.func @transform_4(%arg0: i32) -> (i32, i32) {
    %c0_i32 = arith.constant 0 : i32
    %c0_i32_0 = arith.constant 0 : i32
    %c0_i32_1 = arith.constant 0 : i32
    return %c0_i32, %c0_i32_0 : i32, i32
  }
}

</mosaic_0001>

<bundles_post_ra>
// kernel: encoder_forward.4
= control target key start
LH: loop header
LB: loop body
LE: loop exit
PB: predicated region body
PF: predicated region fallthrough
CT: control target
= control target key end

     0   :  { %vm120_vm0 = vcmask 1044480   ;;  %vm121_vm1 = vcmask 1045504   ;;  %vm95_vm2 = vcmask 220160   ;;  %v680_v1 = vmov 65535   ;;  %s940_s1 = inlined_call_operand.vmem [shape: bf16[27,8], index: 1, kind: input, shape index: {}]   ;;  %s941_s0 = inlined_call_operand.vmem [shape: bf16[128,27], index: 0, kind: input, shape index: {}]   ;;  %s942_s2 = inlined_call_operand.vmem [shape: f32[1,8], index: 2, kind: input, shape index: {}]   ;;  %s943_s3 = inlined_call_operand.vmem [shape: f32[1,8], index: 3, kind: input, shape index: {}]   ;;  %s944_s4 = inlined_call_operand.vmem [shape: bf16[128,8], index: 4, kind: output, shape index: {}]  }
   0x1   :  { %v668_v0 = vld [vmem:[%s940_s1] sm:$0xff]   ;;  %v122_v2 = vsel %vm120_vm0, 4294967295, %v680_v1  ;;  %v669_v3 = vld [vmem:[%s940_s1 + $0x8] sm:$0x3f]   ;;  %v672_v8 = vld [vmem:[%s941_s0 + $0x10] sm:$0xff]   ;;  %vm22_vm3 = vcmask 57344  }
   0x2   :  { %642 = vmatprep.subr.bf16.mxu0 %v668_v0  ;;  %v123_v4 = vsel %vm121_vm1, %v122_v2, 0  ;;  %v670_v5 = vld [vmem:[%s941_s0] sm:$0xff]   ;;  %662 = vmatprep.subr.bf16.mxu1 %v668_v0  ;;  %v671_v7 = vld [vmem:[%s941_s0 + $0x8] sm:$0xff]   ;;  %v676_v11 = vld [vmem:[%s941_s0 + $0x30] sm:$0xff]   ;;  %v681_v14 = vmov 0.0   ;;  %vm226_vm4 = vcmask 64512  }
   0x3   :  { %643 = vmatpush3.bf16.msra.mxu0 %v668_v0  ;;  %v125_v6 = vand.u32 %v669_v3, %v123_v4  ;;  %664 = vmatpush3.bf16.msra.mxu1 %v668_v0  ;;  %v674_v9 = vld [vmem:[%s941_s0 + $0x20] sm:$0xff]   ;;  %v675_v10 = vld [vmem:[%s941_s0 + $0x28] sm:$0xff]   ;;  %v673_v12 = vld [vmem:[%s941_s0 + $0x18] sm:$0xff]   ;;  %23 = vst.msk [vmem:[#allocation3] sm:$0x1] %vm22_vm3, %v681_v14  ;;  %vm561_vm5 = vcmask 60416  }
   0x4   :  { %646 = vmatprep.mubr.msk.bf16.mxu0 %vm95_vm2, %v670_v5  ;;  %654 = vmatprep.mubr.msk.bf16.mxu1 %vm95_vm2, %v674_v9  ;;  %v677_v13 = vld [vmem:[%s941_s0 + $0x38] sm:$0xff]  }
   0x5   :  { %644 = vmatprep.subr.bf16.mxu0 %v125_v6  ;;  %663 = vmatprep.subr.bf16.mxu1 %v125_v6 }
   0x7   :  { %645 = vmatpush3.bf16.msra.mxu0 %v125_v6  ;;  %665 = vmatpush3.bf16.msra.mxu1 %v125_v6  ;;  %v339_v6 = vlaneseq }
   0xa   :  { %647 = vmatmul.mubr.msk.bf16.vlgmr.msra.gmra.mrb[0].mxu0 %vm95_vm2, %v671_v7  ;;  %655 = vmatmul.mubr.msk.bf16.vlgmr.msra.gmra.mrb[0].mxu1 %vm95_vm2, %v675_v10  ;;  %v243_v3 = vld [vmem:[#allocation3] sm:$0x1]  ;;  %v340_v7 = vshrl.u32 %v339_v6, 7 }
   0xb   :  { %650 = vmatprep.mubr.msk.bf16.mxu0 %vm95_vm2, %v672_v8  ;;  %658 = vmatprep.mubr.msk.bf16.mxu1 %vm95_vm2, %v676_v11 }
   0xc   :  { %v779_v8 = vsub.s32 0, %v340_v7 }
  0x12   :  { %651 = vmatmul.mubr.msk.bf16.gmra.mrb[4].mxu0 %vm95_vm2, %v673_v12  ;;  %659 = vmatmul.mubr.msk.bf16.gmra.mrb[4].mxu1 %vm95_vm2, %v677_v13 }
  0xdd   :  { %v648_v15 = vpop.f32.mrb[0].mxu0  ;;  %v656_v16 = vpop.f32.mrb[0].mxu1 }
  0xde   :  { %229 = vst.msk [vmem:[#allocation2 + $0x10] sm:$0xff] %vm226_vm4, %v648_v15  ;;  %v161_v17 = vpop.f32.mrb[1].mxu0  ;;  %237 = vst.msk [vmem:[#allocation2 + $0x50] sm:$0xff] %vm226_vm4, %v656_v16  ;;  %v193_v18 = vpop.f32.mrb[1].mxu1  ;;  %v247_v26 = vsel %vm226_vm4, %v648_v15, 0.0  ;;  %v263_v50 = vsel %vm226_vm4, %v656_v16, 0.0 }
  0xdf   :  { %227 = vst.msk [vmem:[#allocation2] sm:$0xff] %vm226_vm4, %v161_v17  ;;  %v649_v19 = vpop.f32.mrb[2].mxu0  ;;  %235 = vst.msk [vmem:[#allocation2 + $0x40] sm:$0xff] %vm226_vm4, %v193_v18  ;;  %v657_v20 = vpop.f32.mrb[2].mxu1  ;;  %v244_v23 = vsel %vm226_vm4, %v161_v17, 0.0  ;;  %v259_v45 = vsel %vm226_vm4, %v193_v18, 0.0 }
  0xe0   :  { %230 = vst.msk [vmem:[#allocation2 + $0x18] sm:$0xff] %vm226_vm4, %v649_v19  ;;  %v164_v21 = vpop.f32.mrb[3].mxu0  ;;  %238 = vst.msk [vmem:[#allocation2 + $0x58] sm:$0xff] %vm226_vm4, %v657_v20  ;;  %v196_v22 = vpop.f32.mrb[3].mxu1  ;;  %v249_v28 = vsel %vm226_vm4, %v649_v19, 0.0  ;;  %v265_v52 = vsel %vm226_vm4, %v657_v20, 0.0 }
  0xe1   :  { %228 = vst.msk [vmem:[#allocation2 + $0x8] sm:$0xff] %vm226_vm4, %v164_v21  ;;  %v245_v24 = vsel %vm226_vm4, %v164_v21, 0.0  ;;  %236 = vst.msk [vmem:[#allocation2 + $0x48] sm:$0xff] %vm226_vm4, %v196_v22  ;;  %v261_v48 = vsel %vm226_vm4, %v196_v22, 0.0 }
  0xe2   :  { %v246_v25 = vadd.f32 %v245_v24, %v244_v23 }
  0xe4   :  { %v248_v27 = vadd.f32 %v247_v26, %v246_v25 }
  0xe5   :  { %v652_v29 = vpop.f32.mrb[4].mxu0  ;;  %v660_v30 = vpop.f32.mrb[4].mxu1  ;;  %v795_v16 = vld [vmem:[#allocation2 + $0x10] sm:$0xff] }
  0xe6   :  { %233 = vst.msk [vmem:[#allocation2 + $0x30] sm:$0xff] %vm226_vm4, %v652_v29  ;;  %v177_v31 = vpop.f32.mrb[5].mxu0  ;;  %v250_v32 = vadd.f32 %v249_v28, %v248_v27  ;;  %241 = vst.msk [vmem:[#allocation2 + $0x70] sm:$0xff] %vm226_vm4, %v660_v30  ;;  %v209_v33 = vpop.f32.mrb[5].mxu1  ;;  %v255_v42 = vsel %vm226_vm4, %v652_v29, 0.0  ;;  %v271_v58 = vsel %vm226_vm4, %v660_v30, 0.0 }
  0xe7   :  { %231 = vst.msk [vmem:[#allocation2 + $0x20] sm:$0xff] %vm226_vm4, %v177_v31  ;;  %v251_v34 = vsel %vm226_vm4, %v177_v31, 0.0  ;;  %v653_v35 = vpop.f32.mrb[6].mxu0  ;;  %239 = vst.msk [vmem:[#allocation2 + $0x60] sm:$0xff] %vm226_vm4, %v209_v33  ;;  %v661_v36 = vpop.f32.mrb[6].mxu1  ;;  %v267_v53 = vsel %vm226_vm4, %v209_v33, 0.0 }
  0xe8   :  { %v252_v37 = vadd.f32 %v251_v34, %v250_v32  ;;  %234 = vst.msk [vmem:[#allocation2 + $0x38] sm:$0xff] %vm226_vm4, %v653_v35  ;;  %v180_v38 = vpop.f32.mrb[7].mxu0  ;;  %242 = vst.msk [vmem:[#allocation2 + $0x78] sm:$0xff] %vm226_vm4, %v661_v36  ;;  %v212_v39 = vpop.f32.mrb[7].mxu1  ;;  %v257_v44 = vsel %vm226_vm4, %v653_v35, 0.0  ;;  %v273_v60 = vsel %vm226_vm4, %v661_v36, 0.0 }
  0xe9   :  { %232 = vst.msk [vmem:[#allocation2 + $0x28] sm:$0xff] %vm226_vm4, %v180_v38  ;;  %v253_v40 = vsel %vm226_vm4, %v180_v38, 0.0  ;;  %240 = vst.msk [vmem:[#allocation2 + $0x68] sm:$0xff] %vm226_vm4, %v212_v39  ;;  %v269_v56 = vsel %vm226_vm4, %v212_v39, 0.0  ;;  %v787_v12 = vld [vmem:[#allocation2] sm:$0xff]  ;;  %v789_v13 = vld [vmem:[#allocation2 + $0x8] sm:$0xff] }
  0xea   :  { %v254_v41 = vadd.f32 %v253_v40, %v252_v37  ;;  %v799_v18 = vld [vmem:[#allocation2 + $0x18] sm:$0xff]  ;;  %v823_v40 = vld [vmem:[#allocation2 + $0x40] sm:$0xff] }
  0xec   :  { %v256_v43 = vadd.f32 %v255_v42, %v254_v41 }
  0xed   :  { %v813_v30 = vld [vmem:[#allocation2 + $0x30] sm:$0xff] }
  0xee   :  { %v258_v46 = vadd.f32 %v257_v44, %v256_v43  ;;  %v803_v22 = vld [vmem:[#allocation2 + $0x20] sm:$0xff]  ;;  %v303_v6 = vld [vmem:[#allocation2 + $0x70] sm:$0xff] }
  0xef   :  { %v818_v35 = vld [vmem:[#allocation2 + $0x38] sm:$0xff] }
  0xf0   :  { %v260_v47 = vadd.f32 %v259_v45, %v258_v46  ;;  %v807_v25 = vld [vmem:[#allocation2 + $0x28] sm:$0xff] }
  0xf1   :  { %v828_v45 = vld [vmem:[#allocation2 + $0x48] sm:$0xff] }
  0xf2   :  { %v262_v49 = vadd.f32 %v261_v48, %v260_v47 }
  0xf4   :  { %v264_v51 = vadd.f32 %v263_v50, %v262_v49  ;;  %v833_v50 = vld [vmem:[#allocation2 + $0x50] sm:$0xff] }
  0xf6   :  { %v266_v54 = vadd.f32 %v265_v52, %v264_v51 }
  0xf8   :  { %v268_v55 = vadd.f32 %v267_v53, %v266_v54 }
  0xfa   :  { %v270_v57 = vadd.f32 %v269_v56, %v268_v55  ;;  %v838_v55 = vld [vmem:[#allocation2 + $0x58] sm:$0xff] }
  0xfc   :  { %v272_v59 = vadd.f32 %v271_v58, %v270_v57 }
  0xfe   :  { %v274_v61 = vadd.f32 %v273_v60, %v272_v59  ;;  %v301_v60 = vld [vmem:[#allocation2 + $0x60] sm:$0xff] }
 0x100   :  { %v275_v62 = vrot.slane %v274_v61, 4 }
 0x102   :  { %v276_v63 = vadd.f32 %v275_v62, %v274_v61 }
 0x104   :  { %v277_v0 = vrot.slane %v276_v63, 2 }
 0x106   :  { %v278_v1 = vadd.f32 %v277_v0, %v276_v63 }
 0x108   :  { %v279_v2 = vrot.slane %v278_v1, 1 }
 0x10a   :  { %v280_v4 = vadd.f32 %v279_v2, %v278_v1  ;;  %v302_v1 = vld [vmem:[#allocation2 + $0x68] sm:$0xff] }
 0x10c   :  { %v281_v5 = vadd.f32 %v280_v4, %v243_v3 }
 0x10e   :  { %283 = vst.msk [vmem:[#allocation3] sm:$0x1] %vm22_vm3, %v281_v5 }
 0x115   :  { %v287_v9 = vld [vmem:[#allocation3] sm:$0x1] }
 0x116   :  { %v781_v10 = vmul.f32 0.0078125, %v287_v9 }
 0x118   :  { %v785_v11 = vrot.slane %v781_v10, %v779_v8 }
 0x11a   :  { %v344_v14 = vsub.f32 %v787_v12, %v785_v11  ;;  %v345_v15 = vsub.f32 %v789_v13, %v785_v11  ;;  %v346_v17 = vsub.f32 %v795_v16, %v785_v11  ;;  %v347_v19 = vsub.f32 %v799_v18, %v785_v11 }
 0x11b   :  { %v348_v23 = vsub.f32 %v803_v22, %v785_v11  ;;  %v349_v26 = vsub.f32 %v807_v25, %v785_v11  ;;  %v350_v32 = vsub.f32 %v813_v30, %v785_v11  ;;  %v351_v37 = vsub.f32 %v818_v35, %v785_v11 }
 0x11c   :  { %v376_v20 = vmul.f32 %v344_v14, %v344_v14  ;;  %v377_v21 = vmul.f32 %v345_v15, %v345_v15  ;;  %v378_v24 = vmul.f32 %v346_v17, %v346_v17  ;;  %v379_v27 = vmul.f32 %v347_v19, %v347_v19  ;;  %v304_v17 = vld [vmem:[#allocation2 + $0x78] sm:$0xff] }
 0x11d   :  { %v380_v33 = vmul.f32 %v348_v23, %v348_v23  ;;  %v381_v38 = vmul.f32 %v349_v26, %v349_v26  ;;  %v352_v42 = vsub.f32 %v823_v40, %v785_v11  ;;  %v382_v43 = vmul.f32 %v350_v32, %v350_v32 }
 0x11e   :  { %v392_v28 = vsel %vm226_vm4, %v376_v20, 0.0  ;;  %v393_v29 = vsel %vm226_vm4, %v377_v21, 0.0  ;;  %v395_v34 = vsel %vm226_vm4, %v378_v24, 0.0  ;;  %v397_v39 = vsel %vm226_vm4, %v379_v27, 0.0 }
 0x11f   :  { %v394_v31 = vadd.f32 %v393_v29, %v392_v28  ;;  %v399_v44 = vsel %vm226_vm4, %v380_v33, 0.0  ;;  %v353_v47 = vsub.f32 %v828_v45, %v785_v11  ;;  %v383_v48 = vmul.f32 %v351_v37, %v351_v37 }
 0x120   :  { %v401_v49 = vsel %vm226_vm4, %v381_v38, 0.0  ;;  %v354_v52 = vsub.f32 %v833_v50, %v785_v11  ;;  %v384_v53 = vmul.f32 %v352_v42, %v352_v42  ;;  %v403_v54 = vsel %vm226_vm4, %v382_v43, 0.0 }
 0x121   :  { %v396_v36 = vadd.f32 %v395_v34, %v394_v31  ;;  %v355_v57 = vsub.f32 %v838_v55, %v785_v11  ;;  %v385_v58 = vmul.f32 %v353_v47, %v353_v47  ;;  %v405_v59 = vsel %vm226_vm4, %v383_v48, 0.0  ;;  %v430_v47 = vld [vmem:[%s942_s2] sm:$0x1] }
 0x122   :  { %v356_v62 = vsub.f32 %v301_v60, %v785_v11  ;;  %v386_v63 = vmul.f32 %v354_v52, %v354_v52  ;;  %v407_v0 = vsel %vm226_vm4, %v384_v53, 0.0  ;;  %v357_v3 = vsub.f32 %v302_v1, %v785_v11 }
 0x123   :  { %v398_v41 = vadd.f32 %v397_v39, %v396_v36  ;;  %v387_v4 = vmul.f32 %v355_v57, %v355_v57  ;;  %v409_v5 = vsel %vm226_vm4, %v385_v58, 0.0  ;;  %v358_v9 = vsub.f32 %v303_v6, %v785_v11 }
 0x124   :  { %v388_v14 = vmul.f32 %v356_v62, %v356_v62  ;;  %v411_v15 = vsel %vm226_vm4, %v386_v63, 0.0  ;;  %v359_v20 = vsub.f32 %v304_v17, %v785_v11  ;;  %v389_v21 = vmul.f32 %v357_v3, %v357_v3 }
 0x125   :  { %v400_v46 = vadd.f32 %v399_v44, %v398_v41  ;;  %v413_v23 = vsel %vm226_vm4, %v387_v4, 0.0  ;;  %v390_v26 = vmul.f32 %v358_v9, %v358_v9 }
 0x126   :  { %v415_v27 = vsel %vm226_vm4, %v388_v14, 0.0  ;;  %v391_v29 = vmul.f32 %v359_v20, %v359_v20  ;;  %v417_v31 = vsel %vm226_vm4, %v389_v21, 0.0 }
 0x127   :  { %v402_v51 = vadd.f32 %v401_v49, %v400_v46  ;;  %v419_v33 = vsel %vm226_vm4, %v390_v26, 0.0 }
 0x128   :  { %v421_v36 = vsel %vm226_vm4, %v391_v29, 0.0 }
 0x129   :  { %v404_v56 = vadd.f32 %v403_v54, %v402_v51  ;;  %v434_v51 = vld [vmem:[%s943_s3] sm:$0x1] }
 0x12b   :  { %v406_v61 = vadd.f32 %v405_v59, %v404_v56 }
 0x12d   :  { %v408_v2 = vadd.f32 %v407_v0, %v406_v61 }
 0x12f   :  { %v410_v7 = vadd.f32 %v409_v5, %v408_v2 }
 0x131   :  { %v412_v19 = vadd.f32 %v411_v15, %v410_v7 }
 0x133   :  { %v414_v24 = vadd.f32 %v413_v23, %v412_v19 }
 0x135   :  { %v416_v28 = vadd.f32 %v415_v27, %v414_v24 }
 0x137   :  { %v418_v32 = vadd.f32 %v417_v31, %v416_v28 }
 0x139   :  { %v420_v34 = vadd.f32 %v419_v33, %v418_v32 }
 0x13b   :  { %v422_v37 = vadd.f32 %v421_v36, %v420_v34 }
 0x13d   :  { %v423_v38 = vrot.slane %v422_v37, 4 }
 0x13f   :  { %v424_v11 = vadd.f32 %v423_v38, %v422_v37 }
 0x141   :  { %v425_v39 = vrot.slane %v424_v11, 2 }
 0x143   :  { %v426_v41 = vadd.f32 %v425_v39, %v424_v11 }
 0x145   :  { %v427_v42 = vrot.slane %v426_v41, 1 }
 0x147   :  { %v428_v43 = vadd.f32 %v427_v42, %v426_v41 }
 0x149   :  { %v429_v44 = vmul.f32 0.0078125, %v428_v43 }
 0x14b   :  { %v431_v46 = vadd.f32 1e-05, %v429_v44 }
 0x14d   :  { %678 = vrsqrt.f32 %v431_v46 }
 0x157   :  { %v679_v48 = vpop.eup %678 }
 0x158   :  { %v433_v49 = vmul.f32 %v679_v48, %v430_v47 }
 0x15a   :  { %v435_v52 = vmul.f32 %v433_v49, %v781_v10  ;;  %v441_v53 = vrot.slane %v433_v49, %v779_v8 }
 0x15c   :  { %v436_v54 = vsub.f32 %v434_v51, %v435_v52  ;;  %v443_v56 = vmul.f32 %v441_v53, %v787_v12  ;;  %v444_v57 = vmul.f32 %v441_v53, %v789_v13  ;;  %v445_v58 = vmul.f32 %v441_v53, %v795_v16 }
 0x15d   :  { %v446_v59 = vmul.f32 %v441_v53, %v799_v18  ;;  %v447_v61 = vmul.f32 %v441_v53, %v803_v22  ;;  %v448_v62 = vmul.f32 %v441_v53, %v807_v25  ;;  %v449_v63 = vmul.f32 %v441_v53, %v813_v30 }
 0x15e   :  { %v450_v0 = vmul.f32 %v441_v53, %v818_v35  ;;  %v451_v10 = vmul.f32 %v441_v53, %v823_v40  ;;  %v452_v2 = vmul.f32 %v441_v53, %v828_v45  ;;  %v453_v12 = vmul.f32 %v441_v53, %v833_v50 }
 0x15f   :  { %v454_v13 = vmul.f32 %v441_v53, %v838_v55  ;;  %v463_v16 = vrot.slane %v436_v54, %v779_v8  ;;  %v455_v3 = vmul.f32 %v441_v53, %v301_v60  ;;  %v456_v18 = vmul.f32 %v441_v53, %v302_v1 }
 0x160   :  { %v457_v4 = vmul.f32 %v441_v53, %v303_v6  ;;  %v458_v22 = vmul.f32 %v441_v53, %v304_v17 }
 0x161   :  { %v465_v25 = vadd.f32 %v463_v16, %v443_v56  ;;  %v466_v5 = vadd.f32 %v463_v16, %v444_v57  ;;  %v467_v30 = vadd.f32 %v463_v16, %v445_v58  ;;  %v468_v7 = vadd.f32 %v463_v16, %v446_v59 }
 0x162   :  { %v469_v35 = vadd.f32 %v463_v16, %v447_v61  ;;  %v470_v9 = vadd.f32 %v463_v16, %v448_v62  ;;  %v471_v40 = vadd.f32 %v463_v16, %v449_v63  ;;  %v472_v14 = vadd.f32 %v463_v16, %v450_v0 }
 0x163   :  { %v473_v45 = vadd.f32 %v463_v16, %v451_v10  ;;  %v474_v15 = vadd.f32 %v463_v16, %v452_v2  ;;  %v475_v50 = vadd.f32 %v463_v16, %v453_v12  ;;  %v476_v19 = vadd.f32 %v463_v16, %v454_v13 }
 0x164   :  { %v477_v55 = vadd.f32 %v463_v16, %v455_v3  ;;  %v478_v20 = vadd.f32 %v463_v16, %v456_v18  ;;  %v479_v8 = vadd.f32 %v463_v16, %v457_v4  ;;  %v480_v60 = vadd.f32 %v463_v16, %v458_v22 }
 0x165   :  { %v481_v1 = vmax.f32 %v465_v25, 0.0  ;;  %v482_v6 = vmax.f32 %v466_v5, 0.0  ;;  %v483_v17 = vmax.f32 %v467_v30, 0.0  ;;  %v484_v21 = vmax.f32 %v468_v7, 0.0 }
 0x166   :  { %v485_v23 = vmax.f32 %v469_v35, 0.0  ;;  %v486_v24 = vmax.f32 %v470_v9, 0.0  ;;  %v487_v26 = vmax.f32 %v471_v40, 0.0  ;;  %v488_v27 = vmax.f32 %v472_v14, 0.0 }
 0x167   :  { %v489_v28 = vmax.f32 %v473_v45, 0.0  ;;  %v490_v29 = vmax.f32 %v474_v15, 0.0  ;;  %v491_v31 = vmax.f32 %v475_v50, 0.0  ;;  %v492_v32 = vmax.f32 %v476_v19, 0.0 }
 0x168   :  { %v493_v33 = vmax.f32 %v477_v55, 0.0  ;;  %v494_v34 = vmax.f32 %v478_v20, 0.0  ;;  %v495_v36 = vmax.f32 %v479_v8, 0.0  ;;  %v496_v37 = vmax.f32 %v480_v60, 0.0 }
 0x169   :  { %v616_v38 = vpack.c.bf16 %v481_v1, %v481_v1  ;;  %v617_v11 = vpack.c.bf16 %v482_v6, %v482_v6  ;;  %v618_v39 = vpack.c.bf16 %v483_v17, %v483_v17  ;;  %v619_v41 = vpack.c.bf16 %v484_v21, %v484_v21 }
 0x16a   :  { %v620_v42 = vpack.c.bf16 %v485_v23, %v485_v23  ;;  %v621_v43 = vpack.c.bf16 %v486_v24, %v486_v24  ;;  %v622_v44 = vpack.c.bf16 %v487_v26, %v487_v26  ;;  %v623_v46 = vpack.c.bf16 %v488_v27, %v488_v27 }
 0x16b   :  { %v624_v47 = vpack.c.bf16 %v489_v28, %v489_v28  ;;  %v625_v48 = vpack.c.bf16 %v490_v29, %v490_v29  ;;  %v626_v49 = vpack.c.bf16 %v491_v31, %v491_v31  ;;  %v627_v51 = vpack.c.bf16 %v492_v32, %v492_v32  ;;  %562 = vst.msk [vmem:[%s944_s4] sm:$0xf] %vm561_vm5, %v616_v38 }
 0x16c   :  { %563 = vst.msk [vmem:[%s944_s4 + $0x4] sm:$0xf] %vm561_vm5, %v617_v11  ;;  %564 = vst.msk [vmem:[%s944_s4 + $0x8] sm:$0xf] %vm561_vm5, %v618_v39  ;;  %v628_v52 = vpack.c.bf16 %v493_v33, %v493_v33  ;;  %v629_v53 = vpack.c.bf16 %v494_v34, %v494_v34  ;;  %v630_v54 = vpack.c.bf16 %v495_v36, %v495_v36 }
 0x16d   :  { %565 = vst.msk [vmem:[%s944_s4 + $0xc] sm:$0xf] %vm561_vm5, %v619_v41  ;;  %v631_v56 = vpack.c.bf16 %v496_v37, %v496_v37  ;;  %566 = vst.msk [vmem:[%s944_s4 + $0x10] sm:$0xf] %vm561_vm5, %v620_v42 }
 0x16e   :  { %567 = vst.msk [vmem:[%s944_s4 + $0x14] sm:$0xf] %vm561_vm5, %v621_v43  ;;  %568 = vst.msk [vmem:[%s944_s4 + $0x18] sm:$0xf] %vm561_vm5, %v622_v44 }
 0x16f   :  { %569 = vst.msk [vmem:[%s944_s4 + $0x1c] sm:$0xf] %vm561_vm5, %v623_v46  ;;  %570 = vst.msk [vmem:[%s944_s4 + $0x20] sm:$0xf] %vm561_vm5, %v624_v47 }
 0x170   :  { %571 = vst.msk [vmem:[%s944_s4 + $0x24] sm:$0xf] %vm561_vm5, %v625_v48  ;;  %572 = vst.msk [vmem:[%s944_s4 + $0x28] sm:$0xf] %vm561_vm5, %v626_v49 }
 0x171   :  { %573 = vst.msk [vmem:[%s944_s4 + $0x2c] sm:$0xf] %vm561_vm5, %v627_v51  ;;  %574 = vst.msk [vmem:[%s944_s4 + $0x30] sm:$0xf] %vm561_vm5, %v628_v52 }
 0x172   :  { %575 = vst.msk [vmem:[%s944_s4 + $0x34] sm:$0xf] %vm561_vm5, %v629_v53  ;;  %576 = vst.msk [vmem:[%s944_s4 + $0x38] sm:$0xf] %vm561_vm5, %v630_v54 }
 0x173   :  { %577 = vst.msk [vmem:[%s944_s4 + $0x3c] sm:$0xf] %vm561_vm5, %v631_v56 }

// kernel: encoder_forward.5
= control target key start
LH: loop header
LB: loop body
LE: loop exit
PB: predicated region body
PF: predicated region fallthrough
CT: control target
= control target key end

     0   :  { %vm74_vm0 = vcmask 588800   ;;  %vm81_vm1 = vcmask 1043456   ;;  %vm22_vm2 = vcmask 122880   ;;  %v313_v8 = vmov 0.0   ;;  %s392_s1 = inlined_call_operand.vmem [shape: bf16[72,16], index: 1, kind: input, shape index: {}]   ;;  %s393_s0 = inlined_call_operand.vmem [shape: bf16[32,72], index: 0, kind: input, shape index: {}]   ;;  %s394_s2 = inlined_call_operand.vmem [shape: f32[1,16], index: 2, kind: input, shape index: {}]   ;;  %s395_s3 = inlined_call_operand.vmem [shape: f32[1,16], index: 3, kind: input, shape index: {}]   ;;  %s396_s4 = inlined_call_operand.vmem [shape: bf16[32,16], index: 4, kind: output, shape index: {}]  }
   0x1   :  { %v304_v0 = vld [vmem:[%s392_s1] sm:$0xff]   ;;  %v305_v1 = vld [vmem:[%s392_s1 + $0x8] sm:$0xff]   ;;  %v306_v2 = vld [vmem:[%s392_s1 + $0x10] sm:$0xff]   ;;  %23 = vst.msk [vmem:[#allocation3] sm:$0x1] %vm22_vm2, %v313_v8  ;;  %vm136_vm3 = vcmask 130048   ;;  %v177_v28 = vlaneseq }
   0x2   :  { %288 = vmatprep.subr.bf16.mxu0 %v304_v0  ;;  %v309_v3 = vld [vmem:[%s393_s0] sm:$0xff]   ;;  %v307_v4 = vld [vmem:[%s392_s1 + $0x18] sm:$0xff]   ;;  %v310_v7 = vld [vmem:[%s393_s0 + $0x8] sm:$0xff]   ;;  %vm255_vm4 = vcmask 125952  }
   0x3   :  { %289 = vmatpush3.bf16.msra.mxu0 %v304_v0  ;;  %298 = vmatprep.mubr.msk.bf16.mxu0 %vm74_vm0, %v309_v3  ;;  %v308_v5 = vld [vmem:[%s392_s1 + $0x20] ss:$0 sps:$4 sm:$0xff]   ;;  %v178_v29 = vshrl.u32 %v177_v28, 7 }
   0x4   :  { %290 = vmatprep.subr.bf16.mxu0 %v305_v1  ;;  %v83_v6 = vsel %vm81_vm1, %v308_v5, 0  ;;  %v208_v61 = vld [vmem:[%s394_s2] sm:$0x1] }
   0x5   :  { %v179_v30 = vsub.s32 0, %v178_v29  ;;  %v212_v0 = vld [vmem:[%s395_s3] sm:$0x1] }
   0x7   :  { %291 = vmatpush3.bf16.msra.mxu0 %v305_v1 }
   0x8   :  { %292 = vmatprep.subr.bf16.mxu0 %v306_v2  ;;  %v141_v25 = vld [vmem:[#allocation3] sm:$0x1] }
   0xb   :  { %293 = vmatpush3.bf16.msra.mxu0 %v306_v2 }
   0xc   :  { %294 = vmatprep.subr.bf16.mxu0 %v307_v4 }
   0xf   :  { %295 = vmatpush3.bf16.msra.mxu0 %v307_v4 }
  0x10   :  { %302 = vmatprep.subr.msk.bf16.mxu0 %vm81_vm1, %v308_v5 }
  0x13   :  { %297 = vmatpush3.bf16.msra.mxu0 %v83_v6 }
  0x16   :  { %299 = vmatmul.mubr.msk.bf16.vlgmr.msra.gmra.mrb[0].mxu0 %vm74_vm0, %v310_v7 }
  0xe9   :  { %v300_v9 = vpop.f32.mrb[0].mxu0 }
  0xea   :  { %139 = vst.msk [vmem:[#allocation2 + $0x10] sm:$0xff] %vm136_vm3, %v300_v9  ;;  %v119_v10 = vpop.f32.mrb[1].mxu0  ;;  %v145_v16 = vsel %vm136_vm3, %v300_v9, 0.0 }
  0xeb   :  { %137 = vst.msk [vmem:[#allocation2] sm:$0xff] %vm136_vm3, %v119_v10  ;;  %v301_v11 = vpop.f32.mrb[2].mxu0  ;;  %v142_v13 = vsel %vm136_vm3, %v119_v10, 0.0 }
  0xec   :  { %140 = vst.msk [vmem:[#allocation2 + $0x18] sm:$0xff] %vm136_vm3, %v301_v11  ;;  %v122_v12 = vpop.f32.mrb[3].mxu0  ;;  %v147_v18 = vsel %vm136_vm3, %v301_v11, 0.0 }
  0xed   :  { %138 = vst.msk [vmem:[#allocation2 + $0x8] sm:$0xff] %vm136_vm3, %v122_v12  ;;  %v143_v14 = vsel %vm136_vm3, %v122_v12, 0.0 }
  0xee   :  { %v144_v15 = vadd.f32 %v143_v14, %v142_v13 }
  0xf0   :  { %v146_v17 = vadd.f32 %v145_v16, %v144_v15 }
  0xf1   :  { %v165_v33 = vld [vmem:[#allocation2 + $0x10] sm:$0xff] }
  0xf2   :  { %v148_v19 = vadd.f32 %v147_v18, %v146_v17  ;;  %v163_v35 = vld [vmem:[#allocation2] sm:$0xff] }
  0xf3   :  { %v166_v36 = vld [vmem:[#allocation2 + $0x18] sm:$0xff] }
  0xf4   :  { %v149_v20 = vrot.slane %v148_v19, 4  ;;  %v164_v37 = vld [vmem:[#allocation2 + $0x8] sm:$0xff] }
  0xf6   :  { %v150_v21 = vadd.f32 %v149_v20, %v148_v19 }
  0xf8   :  { %v151_v22 = vrot.slane %v150_v21, 2 }
  0xfa   :  { %v152_v23 = vadd.f32 %v151_v22, %v150_v21 }
  0xfc   :  { %v153_v24 = vrot.slane %v152_v23, 1 }
  0xfe   :  { %v154_v26 = vadd.f32 %v153_v24, %v152_v23 }
 0x100   :  { %v155_v27 = vadd.f32 %v154_v26, %v141_v25 }
 0x102   :  { %157 = vst.msk [vmem:[#allocation3] sm:$0x1] %vm22_vm2, %v155_v27 }
 0x109   :  { %v161_v31 = vld [vmem:[#allocation3] sm:$0x1] }
 0x10a   :  { %v162_v32 = vmul.f32 0.03125, %v161_v31 }
 0x10c   :  { %v180_v34 = vrot.slane %v162_v32, %v179_v30 }
 0x10e   :  { %v182_v38 = vsub.f32 %v163_v35, %v180_v34  ;;  %v183_v39 = vsub.f32 %v164_v37, %v180_v34  ;;  %v184_v40 = vsub.f32 %v165_v33, %v180_v34  ;;  %v185_v41 = vsub.f32 %v166_v36, %v180_v34 }
 0x110   :  { %v190_v42 = vmul.f32 %v182_v38, %v182_v38  ;;  %v191_v43 = vmul.f32 %v183_v39, %v183_v39  ;;  %v192_v44 = vmul.f32 %v184_v40, %v184_v40  ;;  %v193_v45 = vmul.f32 %v185_v41, %v185_v41 }
 0x112   :  { %v194_v46 = vsel %vm136_vm3, %v190_v42, 0.0  ;;  %v195_v47 = vsel %vm136_vm3, %v191_v43, 0.0  ;;  %v197_v49 = vsel %vm136_vm3, %v192_v44, 0.0  ;;  %v199_v51 = vsel %vm136_vm3, %v193_v45, 0.0 }
 0x113   :  { %v196_v48 = vadd.f32 %v195_v47, %v194_v46 }
 0x115   :  { %v198_v50 = vadd.f32 %v197_v49, %v196_v48 }
 0x117   :  { %v200_v52 = vadd.f32 %v199_v51, %v198_v50 }
 0x119   :  { %v201_v53 = vrot.slane %v200_v52, 4 }
 0x11b   :  { %v202_v54 = vadd.f32 %v201_v53, %v200_v52 }
 0x11d   :  { %v203_v55 = vrot.slane %v202_v54, 2 }
 0x11f   :  { %v204_v56 = vadd.f32 %v203_v55, %v202_v54 }
 0x121   :  { %v205_v57 = vrot.slane %v204_v56, 1 }
 0x123   :  { %v206_v58 = vadd.f32 %v205_v57, %v204_v56 }
 0x125   :  { %v207_v59 = vmul.f32 0.03125, %v206_v58 }
 0x127   :  { %v209_v60 = vadd.f32 1e-05, %v207_v59 }
 0x129   :  { %311 = vrsqrt.f32 %v209_v60 }
 0x133   :  { %v312_v62 = vpop.eup %311 }
 0x134   :  { %v211_v63 = vmul.f32 %v312_v62, %v208_v61 }
 0x136   :  { %v213_v1 = vmul.f32 %v211_v63, %v162_v32  ;;  %v219_v2 = vrot.slane %v211_v63, %v179_v30 }
 0x138   :  { %v214_v3 = vsub.f32 %v212_v0, %v213_v1  ;;  %v221_v4 = vmul.f32 %v219_v2, %v163_v35  ;;  %v222_v5 = vmul.f32 %v219_v2, %v164_v37  ;;  %v223_v6 = vmul.f32 %v219_v2, %v165_v33 }
 0x139   :  { %v224_v7 = vmul.f32 %v219_v2, %v166_v36 }
 0x13a   :  { %v229_v8 = vrot.slane %v214_v3, %v179_v30 }
 0x13c   :  { %v231_v9 = vadd.f32 %v229_v8, %v221_v4  ;;  %v232_v10 = vadd.f32 %v229_v8, %v222_v5  ;;  %v233_v11 = vadd.f32 %v229_v8, %v223_v6  ;;  %v234_v12 = vadd.f32 %v229_v8, %v224_v7 }
 0x13e   :  { %v235_v13 = vmax.f32 %v231_v9, 0.0  ;;  %v236_v14 = vmax.f32 %v232_v10, 0.0  ;;  %v237_v15 = vmax.f32 %v233_v11, 0.0  ;;  %v238_v16 = vmax.f32 %v234_v12, 0.0 }
 0x140   :  { %v277_v17 = vpack.c.bf16 %v235_v13, %v235_v13  ;;  %v278_v18 = vpack.c.bf16 %v236_v14, %v236_v14  ;;  %v279_v19 = vpack.c.bf16 %v237_v15, %v237_v15  ;;  %v280_v20 = vpack.c.bf16 %v238_v16, %v238_v16 }
 0x142   :  { %256 = vst.msk [vmem:[%s396_s4] sm:$0xf] %vm255_vm4, %v277_v17  ;;  %257 = vst.msk [vmem:[%s396_s4 + $0x4] sm:$0xf] %vm255_vm4, %v278_v18 }
 0x143   :  { %258 = vst.msk [vmem:[%s396_s4 + $0x8] sm:$0xf] %vm255_vm4, %v279_v19  ;;  %259 = vst.msk [vmem:[%s396_s4 + $0xc] sm:$0xf] %vm255_vm4, %v280_v20 }

// kernel: encoder_forward.7
= control target key start
LH: loop header
LB: loop body
LE: loop exit
PB: predicated region body
PF: predicated region fallthrough
CT: control target
= control target key end

     0   :  { %12 = vsyncpa [#allocation3], 0  ;;  %v344_v1 = vmov 0.0   ;;  %vm345_vm0 = vmmov 0   ;;  %s437_s0 = inlined_call_operand.vmem [shape: bf16[2,32], index: 0, kind: input, shape index: {}]   ;;  %s438_s1 = inlined_call_operand.vmem [shape: bf16[32,64], index: 1, kind: input, shape index: {}]   ;;  %s439_s2 = inlined_call_operand.vmem [shape: f32[1,64], index: 2, kind: input, shape index: {}]   ;;  %s440_s3 = inlined_call_operand.vmem [shape: f32[1,64], index: 3, kind: input, shape index: {}]   ;;  %s441_s4 = inlined_call_operand.vmem [shape: bf16[64,32], index: 4, kind: input, shape index: {}]   ;;  %s442_s5 = inlined_call_operand.hbm [shape: f32[2,16], index: 5, kind: output, shape index: {0}]   ;;  %s443_s6 = inlined_call_operand.hbm [shape: f32[2,16], index: 6, kind: output, shape index: {1}]  }
   0x1   :  { %v286_v0 = vld [vmem:[%s438_s1] sm:$0xff]   ;;  %261 = vmatprep.subr.bf16.mxu0 %v344_v1  ;;  %269 = vmatprep.subr.bf16.mxu1 %v344_v1  ;;  %v287_v2 = vld [vmem:[%s438_s1 + $0x8] sm:$0xff]  }
   0x2   :  { %262 = vmatpush3.bf16.msra.mxu0 %v286_v0  ;;  %265 = vmatprep.mubr.msk.bf16.mxu0 %vm345_vm0, %v344_v1 }
   0x3   :  { %263 = vmatprep.subr.bf16.mxu0 %v344_v1  ;;  %277 = vmatprep.mubr.msk.bf16.mxu1 %vm345_vm0, %v344_v1 }
   0x4   :  { %13 = vsyncpa [#allocation5], 0  ;;  %v25_v3 = vld [vmem:[%s437_s0] sm:$0x1]  ;;  %vm42_vm1 = vcmask 261120   ;;  %v289_v5 = vld [vmem:[%s441_s4 + $0x8] sm:$0xff]  }
   0x5   :  { %v288_v4 = vld [vmem:[%s441_s4] sm:$0xff]   ;;  %v290_v6 = vld [vmem:[%s441_s4 + $0x10] sm:$0xff]   ;;  %v291_v7 = vld [vmem:[%s441_s4 + $0x18] sm:$0xff]   ;;  %vm86_vm2 = vcmask 517120   ;;  %vm159_vm3 = vcmask 523264   ;;  %vm203_vm4 = vcmask 123904  }
   0x6   :  { %264 = vmatpush3.bf16.msra.mxu0 %v287_v2  ;;  %270 = vmatpush3.bf16.msra.mxu1 %v288_v4  ;;  %v246_v32 = vld [vmem:[%s439_s2] ss:$0 sm:$0xff]  ;;  %s346_s2 = smov [#allocation2]  }
   0x7   :  { %271 = vmatprep.subr.bf16.mxu1 %v344_v1  ;;  %v247_v34 = vld [vmem:[%s440_s3] ss:$0 sm:$0xff]  ;;  %s221_s12 = sshll.u32 %s346_s2, 4  ;;  %s222_s12 = int_to_ptr.vmem [resolvable:$true] %s221_s12 }
   0x8   :  { %s296_s13 = scalar_lea.vmem %s222_s12, 32  ;;  %p301_p1 = scmp.lt.s32.totalorder %s222_s12, %s222_s12 }
   0x9   :  { %266 = vmatmul.mubr.msk.bf16.vlgmr.msra.gmra.mrb[0].mxu0 %vm42_vm1, %v25_v3  ;;  %p297_p0 = scmp.ne.s32.totalorder %s222_s12, %s296_s13  ;;  %p302_p2 = scmp.lt.s32.totalorder %s296_s13, %s296_s13 }
   0xa   :  { %272 = vmatpush3.bf16.msra.mxu1 %v289_v5 }
   0xb   :  { %273 = vmatprep.subr.bf16.mxu1 %v344_v1  ;;  %p303_p3 = por %p302_p2, %p301_p1 }
   0xd   :  { %p304_p4 = pnand %p303_p3, %p297_p0 }
   0xe   :  { %274 = vmatpush3.bf16.msra.mxu1 %v290_v6 }
   0xf   :  { %275 = vmatprep.subr.bf16.mxu1 %v344_v1 }
  0x12   :  { %276 = vmatpush3.bf16.msra.mxu1 %v291_v7 }
  0xdc   :  { %v80_v8 = vpop.f32.mrb[0].mxu0 }
  0xdd   :  { %v87_v9 = vsel %vm86_vm2, %v80_v8, 0.0  ;;  %v267_v10 = vpop.f32.mrb[1].mxu0 }
  0xde   :  { %v88_v11 = vrot.slane %v87_v9, 4  ;;  %v83_v12 = vpop.f32.mrb[2].mxu0 }
  0xdf   :  { %v268_v13 = vpop.f32.mrb[3].mxu0 }
  0xe0   :  { %v89_v14 = vadd.f32 %v88_v11, %v87_v9 }
  0xe2   :  { %v90_v15 = vrot.slane %v89_v14, 2 }
  0xe4   :  { %v91_v16 = vadd.f32 %v90_v15, %v89_v14 }
  0xe6   :  { %v92_v17 = vrot.slane %v91_v16, 1 }
  0xe8   :  { %v93_v18 = vadd.f32 %v92_v17, %v91_v16 }
  0xea   :  { %v95_v19 = vmul.f32 0.5, %v93_v18 }
  0xec   :  { %v96_v20 = vsub.f32 %v80_v8, %v95_v19 }
  0xee   :  { %v97_v21 = vmul.f32 %v96_v20, %v96_v20 }
  0xf0   :  { %v98_v22 = vsel %vm86_vm2, %v97_v21, 0.0 }
  0xf1   :  { %v99_v23 = vrot.slane %v98_v22, 4 }
  0xf3   :  { %v100_v24 = vadd.f32 %v99_v23, %v98_v22 }
  0xf5   :  { %v101_v25 = vrot.slane %v100_v24, 2 }
  0xf7   :  { %v102_v26 = vadd.f32 %v101_v25, %v100_v24 }
  0xf9   :  { %v103_v27 = vrot.slane %v102_v26, 1 }
  0xfb   :  { %v104_v28 = vadd.f32 %v103_v27, %v102_v26 }
  0xfd   :  { %v105_v29 = vmul.f32 0.5, %v104_v28 }
  0xff   :  { %v106_v30 = vadd.f32 1e-05, %v105_v29 }
 0x101   :  { %292 = vrsqrt.f32 %v106_v30 }
 0x10b   :  { %v293_v31 = vpop.eup %292 }
 0x10c   :  { %v108_v33 = vmul.f32 %v293_v31, %v96_v20 }
 0x10e   :  { %v116_v35 = vmul.f32 %v246_v32, %v108_v33 }
 0x110   :  { %v124_v36 = vadd.f32 %v247_v34, %v116_v35 }
 0x112   :  { %v125_v37 = vmax.f32 %v124_v36, 0.0 }
 0x114   :  { %v126_v38 = vpack.c.bf16 %v125_v37, %v125_v37 }
 0x116   :  { %278 = vmatmul.mubr.msk.bf16.vlgmr.msra.gmra.mrb[0].mxu1 %vm159_vm3, %v126_v38 }
 0x1e9   :  { %v197_v39 = vpop.f32.mrb[0].mxu1 }
 0x1ea   :  { %v206_v40 = vmul.f32 1.442695, %v197_v39  ;;  %v279_v41 = vpop.f32.mrb[1].mxu1  ;;  %204 = vst.msk [vmem:[#allocation2] sm:$0x3] %vm203_vm4, %v197_v39 }
 0x1eb   :  { %v200_v42 = vpop.f32.mrb[2].mxu1 }
 0x1ec   :  { %294 = vpow2.f32 %v206_v40  ;;  %v280_v43 = vpop.f32.mrb[3].mxu1 }
 0x1ed   :  { %307 = shalt.err (!%p304_p4)
}
 0x1ee   :  { %s308_s15 = scalar_lea.hbm %s442_s5, 32 }
 0x1ef   :  { %p309_p5 = scmp.ne.s32.totalorder %s442_s5, %s308_s15  ;;  %p312_p6 = scmp.lt.u32.totalorder %s308_s15, %s442_s5 }
 0x1f1   :  { %p314_p7 = pnand %p312_p6, %p309_p5 }
 0x1f3   :  { %317 = shalt.err (!%p314_p7)
}
 0x1f4   :  { %224 = dma.vmem_to_hbm [thread:$0]  %s222_s12, 32, %s442_s5, [#allocation3]   ;;  %vm205_vm5 = vcmp.gt.f32.partialorder %v197_v39, 20.0 }
 0x1f5   :  { %s347_s22 = smov 112   ;;  %s348_s23 = smov [#allocation4]  }
 0x1f6   :  { %v295_v44 = vpop.eup %294  ;;  %s231_s24 = sshll.u32 %s348_s23, 4  ;;  %s232_s24 = int_to_ptr.vmem [resolvable:$true] %s231_s24 }
 0x1f7   :  { %v208_v45 = vadd.f32 1.0, %v295_v44  ;;  %s318_s25 = scalar_lea.vmem %s232_s24, 32  ;;  %p323_p9 = scmp.lt.s32.totalorder %s232_s24, %s232_s24 }
 0x1f8   :  { %p319_p8 = scmp.ne.s32.totalorder %s232_s24, %s318_s25  ;;  %p324_p10 = scmp.lt.s32.totalorder %s318_s25, %s318_s25 }
 0x1f9   :  { %v209_v46 = vsel %vm205_vm5, %v295_v44, %v208_v45 }
 0x1fa   :  { %211 = vrot.lane.b32.xlu0 %v209_v46, %s347_s22  ;;  %p325_p11 = por %p324_p10, %p323_p9 }
 0x1fc   :  { %p326_p12 = pnand %p325_p11, %p319_p8 }
 0x26c   :  { %v212_v47 = vpop.permute.xlu0 %211 }
 0x26d   :  { %214 = vst.msk [vmem:[#allocation4] sm:$0x3] %vm203_vm4, %v212_v47 }
 0x26e   :  { %329 = shalt.err (!%p326_p12)
}
 0x26f   :  { %s330_s27 = scalar_lea.hbm %s443_s6, 32 }
 0x270   :  { %p331_p13 = scmp.ne.s32.totalorder %s443_s6, %s330_s27  ;;  %p334_p0 = scmp.lt.u32.totalorder %s330_s27, %s443_s6 }
 0x272   :  { %p336_p1 = pnand %p334_p0, %p331_p13 }
 0x274   :  { %339 = shalt.err (!%p336_p1)
}
 0x275   :  { %234 = dma.vmem_to_hbm [thread:$0]  %s232_s24, 32, %s443_s6, [#allocation5]  }
 0x276   :  { %340 = dma.done.wait [#allocation3], 32  }
 0x277   :  { %341 = vsyncadd [#allocation3], 4294967264 }
 0x278   :  { %342 = dma.done.wait [#allocation5], 32  }
 0x279   :  { %343 = vsyncadd [#allocation5], 4294967264 }
 0x27a   :  { %241 = vsyncpa [#allocation3], 1 }
 0x27b   :  { %242 = vsyncpa [#allocation5], 1 }

// kernel: encoder_forward.6
= control target key start
LH: loop header
LB: loop body
LE: loop exit
PB: predicated region body
PF: predicated region fallthrough
CT: control target
= control target key end

     0   :  { %vm22_vm0 = vcmask 253952   ;;  %v244_v0 = vmov 0   ;;  %v245_v2 = vmov 0.0   ;;  %vm103_vm1 = vcmask 130048   ;;  %s315_s1 = inlined_call_operand.vmem [shape: bf16[144,32], index: 1, kind: input, shape index: {}]   ;;  %s316_s0 = inlined_call_operand.vmem [shape: bf16[8,144], index: 0, kind: input, shape index: {}]   ;;  %s317_s2 = inlined_call_operand.vmem [shape: f32[1,32], index: 2, kind: input, shape index: {}]   ;;  %s318_s3 = inlined_call_operand.vmem [shape: f32[1,32], index: 3, kind: input, shape index: {}]   ;;  %s319_s4 = inlined_call_operand.vmem [shape: bf16[8,32], index: 4, kind: output, shape index: {}]  }
   0x1   :  { %107 = vmatprep.subr.bf16.mxu0 %v244_v0  ;;  %v231_v1 = vld [vmem:[%s315_s1] sm:$0xff]   ;;  %23 = vst.msk [vmem:[#allocation3] sm:$0x1] %vm22_vm0, %v245_v2  ;;  %v232_v3 = vld [vmem:[%s315_s1 + $0x8] sm:$0xff]   ;;  %v233_v4 = vld [vmem:[%s315_s1 + $0x10] sm:$0xff]   ;;  %vm149_vm2 = vcmask 261120   ;;  %v172_v27 = vlaneseq }
   0x2   :  { %108 = vmatpush1.bf16.msra.mxu0 %v231_v1  ;;  %v24_v5 = vld [vmem:[%s316_s0] sm:$0xff]  ;;  %v234_v6 = vld [vmem:[%s315_s1 + $0x18] sm:$0xff]   ;;  %v236_v9 = vld [vmem:[%s315_s1 + $0x28] sm:$0xff]   ;;  %vm211_vm3 = vcmask 257024  }
   0x3   :  { %109 = vmatprep.subr.bf16.mxu0 %v244_v0  ;;  %v218_v7 = vcombine.high %v24_v5, %v24_v5  ;;  %v235_v8 = vld [vmem:[%s315_s1 + $0x20] sm:$0xff]   ;;  %v237_v10 = vld [vmem:[%s315_s1 + $0x30] sm:$0xff]   ;;  %v238_v11 = vld [vmem:[%s315_s1 + $0x38] sm:$0xff]   ;;  %v217_v13 = vcombine.low %v24_v5, %v24_v5  ;;  %v173_v28 = vshrl.u32 %v172_v27, 7 }
   0x4   :  { %v239_v12 = vld [vmem:[%s315_s1 + $0x40] sm:$0xff]  }
   0x5   :  { %228 = vmatprep.mubr.msk.bf16.mxu0 %vm103_vm1, %v218_v7  ;;  %v174_v29 = vsub.s32 0, %v173_v28  ;;  %v188_v45 = vld [vmem:[%s317_s2] sm:$0x1] }
   0x6   :  { %110 = vmatpush1.bf16.msra.mxu0 %v232_v3  ;;  %v192_v48 = vld [vmem:[%s318_s3] sm:$0x1] }
   0x7   :  { %111 = vmatprep.subr.bf16.mxu0 %v244_v0 }
   0x8   :  { %v151_v24 = vld [vmem:[#allocation3] sm:$0x1] }
   0xa   :  { %112 = vmatpush1.bf16.msra.mxu0 %v233_v4 }
   0xb   :  { %113 = vmatprep.subr.bf16.mxu0 %v244_v0 }
   0xe   :  { %114 = vmatpush1.bf16.msra.mxu0 %v234_v6 }
   0xf   :  { %115 = vmatprep.subr.bf16.mxu0 %v244_v0 }
  0x12   :  { %116 = vmatpush1.bf16.msra.mxu0 %v235_v8 }
  0x13   :  { %117 = vmatprep.subr.bf16.mxu0 %v244_v0 }
  0x16   :  { %118 = vmatpush1.bf16.msra.mxu0 %v236_v9 }
  0x17   :  { %119 = vmatprep.subr.bf16.mxu0 %v244_v0 }
  0x1a   :  { %120 = vmatpush1.bf16.msra.mxu0 %v237_v10 }
  0x1b   :  { %121 = vmatprep.subr.bf16.mxu0 %v244_v0 }
  0x1e   :  { %122 = vmatpush1.bf16.msra.mxu0 %v238_v11 }
  0x1f   :  { %123 = vmatprep.subr.bf16.mxu0 %v244_v0 }
  0x22   :  { %124 = vmatpush1.bf16.msra.mxu0 %v239_v12 }
  0x25   :  { %140 = vmatmul.mubr.bf16.vlgmr.msra.gmra.mrb[0].mxu0 %v217_v13 }
  0xf8   :  { %v141_v14 = vpop.f32.mrb[0].mxu0 }
  0xf9   :  { %150 = vst.msk [vmem:[#allocation2] sm:$0xff] %vm149_vm2, %v141_v14  ;;  %v152_v15 = vsel %vm149_vm2, %v141_v14, 0.0  ;;  %v143_v16 = vpop.f32.mrb[1].mxu0 }
  0xfa   :  { %v153_v17 = vrot.slane %v152_v15, 4  ;;  %v144_v18 = vpop.f32.mrb[2].mxu0 }
  0xfb   :  { %v145_v19 = vpop.f32.mrb[3].mxu0 }
  0xfc   :  { %v154_v20 = vadd.f32 %v153_v17, %v152_v15 }
  0xfe   :  { %v155_v21 = vrot.slane %v154_v20, 2 }
 0x100   :  { %v156_v22 = vadd.f32 %v155_v21, %v154_v20  ;;  %v167_v33 = vld [vmem:[#allocation2] sm:$0xff] }
 0x102   :  { %v157_v23 = vrot.slane %v156_v22, 1 }
 0x104   :  { %v158_v25 = vadd.f32 %v157_v23, %v156_v22 }
 0x106   :  { %v159_v26 = vadd.f32 %v158_v25, %v151_v24 }
 0x108   :  { %161 = vst.msk [vmem:[#allocation3] sm:$0x1] %vm22_vm0, %v159_v26 }
 0x10f   :  { %v165_v30 = vld [vmem:[#allocation3] sm:$0x1] }
 0x110   :  { %v166_v31 = vmul.f32 0.125, %v165_v30 }
 0x112   :  { %v175_v32 = vrot.slane %v166_v31, %v174_v29 }
 0x114   :  { %v177_v34 = vsub.f32 %v167_v33, %v175_v32 }
 0x116   :  { %v179_v35 = vmul.f32 %v177_v34, %v177_v34 }
 0x118   :  { %v180_v36 = vsel %vm149_vm2, %v179_v35, 0.0 }
 0x119   :  { %v181_v37 = vrot.slane %v180_v36, 4 }
 0x11b   :  { %v182_v38 = vadd.f32 %v181_v37, %v180_v36 }
 0x11d   :  { %v183_v39 = vrot.slane %v182_v38, 2 }
 0x11f   :  { %v184_v40 = vadd.f32 %v183_v39, %v182_v38 }
 0x121   :  { %v185_v41 = vrot.slane %v184_v40, 1 }
 0x123   :  { %v186_v42 = vadd.f32 %v185_v41, %v184_v40 }
 0x125   :  { %v187_v43 = vmul.f32 0.125, %v186_v42 }
 0x127   :  { %v189_v44 = vadd.f32 1e-05, %v187_v43 }
 0x129   :  { %242 = vrsqrt.f32 %v189_v44 }
 0x133   :  { %v243_v46 = vpop.eup %242 }
 0x134   :  { %v191_v47 = vmul.f32 %v243_v46, %v188_v45 }
 0x136   :  { %v193_v49 = vmul.f32 %v191_v47, %v166_v31  ;;  %v199_v50 = vrot.slane %v191_v47, %v174_v29 }
 0x138   :  { %v194_v51 = vsub.f32 %v192_v48, %v193_v49  ;;  %v201_v52 = vmul.f32 %v199_v50, %v167_v33 }
 0x13a   :  { %v206_v53 = vrot.slane %v194_v51, %v174_v29 }
 0x13c   :  { %v208_v54 = vadd.f32 %v206_v53, %v201_v52 }
 0x13e   :  { %v209_v55 = vmax.f32 %v208_v54, 0.0 }
 0x140   :  { %v210_v56 = vpack.c.bf16 %v209_v55, %v209_v55 }
 0x142   :  { %212 = vst.msk [vmem:[%s319_s4] sm:$0xf] %vm211_vm3, %v210_v56 }

</bundles_post_ra>
